<compile_context>
chip_gen: v6e
topology: v6e:2x2x1
jax: 0.10.0
libtpu: 0.0.40
codegen_flags: <defaults>
</compile_context>

<pallas_src>
import math

import jax
import jax.numpy as jnp
import numpy as np
from jax.experimental import pallas as pl
from jax.experimental.pallas import tpu as pltpu

NEG_SLOPE = 0.2
EPS = 1e-5

# (Cin, Cout, stride, has_instance_norm, has_leaky_relu)
BLOCK_CFG = [
    (4, 8, 2, False, True),
    (8, 16, 2, True, True),
    (16, 32, 1, True, True),
    (32, 1, 1, False, False),
]


# ---------------------------------------------------------------------------
# In-kernel helpers
# ---------------------------------------------------------------------------
def _leaky(x):
    return jnp.where(x >= 0, x, NEG_SLOPE * x)


def _conv_taps_T(src_ref, w_ref, k, wp, le, cout):
    """Sum over k*k taps of  w[t] (Cout,Cin)  @  src[:, off:off+le] (Cin,le).

    src_ref holds a zero-padded activation in channel-major layout
    (Cin, Hp*Wp); valid conv outputs end up at columns oi*wp + oj.
    bf16 operands, f32 accumulation on the MXU.
    """
    acc = jnp.zeros((cout, le), jnp.float32)
    for di in range(k):
        for dj in range(k):
            t = di * k + dj
            off = di * wp + dj
            acc = acc + jnp.dot(w_ref[t], src_ref[:, off:off + le],
                                preferred_element_type=jnp.float32)
    return acc


def _norm_act(acc, bias, wp, ho, wo, do_norm, do_act):
    """Bias + optional InstanceNorm + optional LeakyReLU, on the whole
    (Cout, le) accumulator.  The InstanceNorm statistics use a single masked
    lane-reduction over the valid output columns (col % wp < wo).  All f32."""
    acc = acc + bias                                   # (C, le) + (C, 1)
    if do_norm:
        col = jax.lax.broadcasted_iota(jnp.int32, acc.shape, 1)
        valid = (col % wp) < wo                        # le <= ho*wp by design
        inv_n = 1.0 / float(ho * wo)
        mean = jnp.where(valid, acc, 0.0).sum(axis=1, keepdims=True) * inv_n
        d = jnp.where(valid, acc - mean, 0.0)
        var = (d * d).sum(axis=1, keepdims=True) * inv_n
        acc = (acc - mean) * jax.lax.rsqrt(var + EPS)
    if do_act:
        acc = _leaky(acc)
    return acc


# ---------------------------------------------------------------------------
# The fused kernel (one grid step == one batch element)
# ---------------------------------------------------------------------------
def _patch_critic_kernel(p0_ref, w0_ref, b0_ref, w1_ref, b1_ref,
                         w2_ref, b2_ref, w3_ref, b3_ref,
                         o0_ref, o1_ref, o2_ref, o3_ref,
                         s1_ref, s2_ref, s3_ref):
    bf16 = jnp.bfloat16

    # Zero the padded scratch activations (interiors are filled below).
    s1_ref[...] = jnp.zeros_like(s1_ref)
    s2_ref[...] = jnp.zeros_like(s2_ref)
    s3_ref[...] = jnp.zeros_like(s3_ref)

    # ---- block 0: 4x4/s2 conv as a single (8,64)x(64,64) MXU matmul --------
    # p0 columns are the 64 output positions in *parity-grouped* order
    # (see _block0_patches); rows are the im2col features (cin, kh, kw).
    y0 = jnp.dot(w0_ref[...], p0_ref[...], preferred_element_type=jnp.float32)
    y0 = _leaky(y0 + b0_ref[...])                      # (8, 64) f32
    o0_ref[...] = y0                                   # lane-dense spatial axis

    # Scatter block-0's output into block-1's input: a zero-padded 5x5
    # space-to-depth grid with channel layout (parity-group g, ch), so the
    # original stride-2 4x4 conv becomes a stride-1 2x2 conv.
    y0b = y0.astype(bf16)
    for ip in range(2):                                # row parity of output i
        for jp in range(2):                            # col parity of output j
            g = 2 * ip + jp
            for pp in range(4):                        # i // 2
                col = (pp + ip) * 5 + jp
                src = y0b[:, g * 16 + pp * 4: g * 16 + pp * 4 + 4]   # (8, 4)
                s1_ref[g * 8:(g + 1) * 8, col:col + 4] = src

    # ---- block 1: (4x4, s2) conv == 2x2 s1 conv on s2d grid; IN + LReLU ----
    acc1 = _conv_taps_T(s1_ref, w1_ref, k=2, wp=5, le=3 * 5 + 4, cout=16)
    y1 = _norm_act(acc1, b1_ref[...], wp=5, ho=4, wo=4,
                   do_norm=True, do_act=True)
    for oi in range(4):
        p = y1[:, oi * 5: oi * 5 + 4]                  # (16, 4)
        o1_ref[:, oi * 4:(oi + 1) * 4] = p
        s2_ref[:, (oi + 1) * 6 + 1:(oi + 1) * 6 + 5] = p.astype(bf16)

    # ---- block 2: 4x4 stride-1 conv; IN + LReLU ----------------------------
    acc2 = _conv_taps_T(s2_ref, w2_ref, k=4, wp=6, le=2 * 6 + 3, cout=32)
    y2 = _norm_act(acc2, b2_ref[...], wp=6, ho=3, wo=3,
                   do_norm=True, do_act=True)
    for oi in range(3):
        p = y2[:, oi * 6: oi * 6 + 3]                  # (32, 3)
        o2_ref[:, oi * 3:(oi + 1) * 3] = p
        s3_ref[:, (oi + 1) * 5 + 1:(oi + 1) * 5 + 4] = p.astype(bf16)

    # ---- block 3: 4x4 stride-1 conv, Cout padded 1 -> 8, no norm / act -----
    acc3 = _conv_taps_T(s3_ref, w3_ref, k=4, wp=5, le=1 * 5 + 2, cout=8)
    acc3 = acc3 + b3_ref[...]
    for oi in range(2):
        o3_ref[:, oi * 2:(oi + 1) * 2] = acc3[0:1, oi * 5: oi * 5 + 2]


# ---------------------------------------------------------------------------
# Wrapper-side (plain JAX) prep: im2col for block 0, static weight remaps
# ---------------------------------------------------------------------------
def _block0_patches(x):
    """x: (B, 4, 16, 16) -> (B, 64, 64).

    Rows: im2col features, K-major (c, kh, kw) — matches w0.reshape(8, 64).
    Cols: the 8x8 stride-2 outputs in parity-grouped order
        new = g*16 + p*4 + q,  g = (i%2)*2 + (j%2),  p = i//2,  q = j//2.
    Built with slices/reshapes/transposes only (no gather).
    """
    B, C, _, _ = x.shape
    xp = jnp.pad(x, ((0, 0), (0, 0), (1, 1), (1, 1)))
    cols = []
    for di in range(4):
        for dj in range(4):
            cols.append(xp[:, :, di:di + 16:2, dj:dj + 16:2])   # (B, C, 8, 8)
    p = jnp.stack(cols, axis=2)                        # (B, C, 16, 8, 8)
    p = p.reshape(B, C * 16, 4, 2, 4, 2)               # (B, 64, p, ip, q, jp)
    p = p.transpose(0, 1, 3, 5, 2, 4)                  # (B, 64, ip, jp, p, q)
    return p.reshape(B, 64, 64)


def _prep_weights(params):
    (w0, b0), (w1, b1), (w2, b2), (w3, b3) = params
    bf16 = jnp.bfloat16
    # block 0: full im2col weight, (Cout, Cin*k*k).
    w0m = w0.reshape(8, 64).astype(bf16)
    # block 1: remap the 4x4 stride-2 weight onto the 2x2 space-to-depth conv.
    #   di = 2*kp + (1 - ip),  dj = 2*kq + (1 - jp);  input ch' = g*8 + ch.
    wt = w1.reshape(16, 8, 2, 2, 2, 2)            # oc, ch, kp, ri, kq, rj
    wt = wt.transpose(2, 4, 0, 3, 5, 1)           # kp, kq, oc, ri, rj, ch
    wt = wt[:, :, :, ::-1, ::-1, :]               # index by ip = 1-ri, jp = 1-rj
    w1m = wt.reshape(4, 16, 32).astype(bf16)      # (tap, Cout, 4*Cin)
    # blocks 2/3: per-tap (Cout, Cin) matrices, tap index t = di*4 + dj.
    w2m = w2.transpose(2, 3, 0, 1).reshape(16, 32, 16).astype(bf16)
    w3m = jnp.pad(w3.transpose(2, 3, 0, 1).reshape(16, 1, 32),
                  ((0, 0), (0, 7), (0, 0))).astype(bf16)   # pad Cout 1 -> 8
    b0m = b0.reshape(8, 1)
    b1m = b1.reshape(16, 1)
    b2m = b2.reshape(32, 1)
    b3m = jnp.pad(b3.reshape(1, 1), ((0, 7), (0, 0)))
    return w0m, b0m, w1m, b1m, w2m, b2m, w3m, b3m


# ---------------------------------------------------------------------------
# PatchCritic forward (patch_size = 16 variant)
# ---------------------------------------------------------------------------
def patch_critic_forward(x, params):
    """x: (B, 4, 16, 16) NCHW -> list of 4 NCHW feature maps."""
    B = x.shape[0]
    w0m, b0m, w1m, b1m, w2m, b2m, w3m, b3m = _prep_weights(params)

    p0 = _block0_patches(x).astype(jnp.bfloat16)          # (B, 64, 64)

    def cmap(*shape):
        return pl.BlockSpec(shape, lambda b: (0,) * len(shape))

    o0, o1, o2, o3 = pl.pallas_call(
        _patch_critic_kernel,
        out_shape=(jax.ShapeDtypeStruct((B, 8, 64), jnp.float32),
                   jax.ShapeDtypeStruct((B, 16, 16), jnp.float32),
                   jax.ShapeDtypeStruct((B, 32, 9), jnp.float32),
                   jax.ShapeDtypeStruct((B, 1, 4), jnp.float32)),
        grid=(B,),
        in_specs=[pl.BlockSpec((None, 64, 64), lambda b: (b, 0, 0)),
                  cmap(8, 64), cmap(8, 1),
                  cmap(4, 16, 32), cmap(16, 1),
                  cmap(16, 32, 16), cmap(32, 1),
                  cmap(16, 8, 32), cmap(8, 1)],
        out_specs=[pl.BlockSpec((None, 8, 64), lambda b: (b, 0, 0)),
                   pl.BlockSpec((None, 16, 16), lambda b: (b, 0, 0)),
                   pl.BlockSpec((None, 32, 9), lambda b: (b, 0, 0)),
                   pl.BlockSpec((None, 1, 4), lambda b: (b, 0, 0))],
        scratch_shapes=[pltpu.VMEM((32, 25), jnp.bfloat16),   # block-1 s2d input
                        pltpu.VMEM((16, 36), jnp.bfloat16),   # block-2 padded in
                        pltpu.VMEM((32, 25), jnp.bfloat16)],  # block-3 padded in
        compiler_params=pltpu.CompilerParams(
            dimension_semantics=("parallel",)),
    )(p0, w0m, b0m, w1m, b1m, w2m, b2m, w3m, b3m)

    # Kernel outputs are channel-major (B, C, L); only reshapes/transposes are
    # needed to recover NCHW (block 0 additionally un-groups the parity order).
    out0 = (o0.reshape(B, 8, 2, 2, 4, 4)                  # (B, C, ip, jp, p, q)
              .transpose(0, 1, 4, 2, 5, 3)                # (B, C, p, ip, q, jp)
              .reshape(B, 8, 8, 8))
    out1 = o1.reshape(B, 16, 4, 4)
    out2 = o2.reshape(B, 32, 3, 3)
    out3 = o3.reshape(B, 1, 2, 2)
    return [out0, out1, out2, out3]


# ---------------------------------------------------------------------------
# Pure-JAX reference (for correctness check)
# ---------------------------------------------------------------------------
def patch_critic_ref(x, params):
    outs = []
    cur = x
    for (cin, cout, stride, do_norm, do_act), (w, b) in zip(BLOCK_CFG, params):
        y = jax.lax.conv_general_dilated(
            cur, w, (stride, stride), ((1, 1), (1, 1)),
            dimension_numbers=("NCHW", "OIHW", "NCHW"),
            precision=jax.lax.Precision.HIGHEST)
        y = y + b.reshape(1, -1, 1, 1)
        if do_norm:
            mean = jnp.mean(y, axis=(2, 3), keepdims=True)
            var = jnp.mean((y - mean) ** 2, axis=(2, 3), keepdims=True)
            y = (y - mean) / jnp.sqrt(var + 1e-5)
        if do_act:
            y = jnp.where(y >= 0, y, 0.2 * y)
        cur = y
        outs.append(cur)
    return outs


# ---------------------------------------------------------------------------
# Deterministic parameter init (PyTorch-style uniform bounds, synthetic)
# ---------------------------------------------------------------------------
def init_params(key):
    params = []
    for i, (cin, cout, _, _, _) in enumerate(BLOCK_CFG):
        kw, kb = jax.random.split(jax.random.fold_in(key, i))
        fan_in = cin * 4 * 4
        bound = 1.0 / math.sqrt(fan_in)
        w = jax.random.uniform(kw, (cout, cin, 4, 4), jnp.float32, -bound, bound)
        b = jax.random.uniform(kb, (cout,), jnp.float32, -bound, bound)
        params.append((w, b))
    return params


if __name__ == "__main__":
    key = jax.random.PRNGKey(0)
    k_x, k_p = jax.random.split(key)

    x = jax.random.normal(k_x, (2, 4, 16, 16), jnp.float32)   # NCHW, like PyTorch
    params = init_params(k_p)

    fwd = jax.jit(patch_critic_forward)
    outs = fwd(x, params)
    outs = [jax.block_until_ready(o) for o in outs]

    expected_shapes = [(2, 8, 8, 8), (2, 16, 4, 4), (2, 32, 3, 3), (2, 1, 2, 2)]
    assert [tuple(o.shape) for o in outs] == expected_shapes, \
        [tuple(o.shape) for o in outs]

    refs = patch_critic_ref(x, params)
    # bf16 MXU operands -> compare against the f32 HIGHEST reference with a
    # correspondingly relaxed tolerance.
    for o, r in zip(outs, refs):
        np.testing.assert_allclose(np.asarray(o), np.asarray(r),
                                   atol=2e-2, rtol=2e-2)

    print("KERNEL_OK")
</pallas_src>

<mosaic_0001>
module attributes {stable_mosaic.version = 11 : i64} {
  func.func @_patch_critic_kernel(%arg0: i32, %arg1: memref<1x64x64xbf16, #tpu.memory_space<vmem>>, %arg2: memref<8x64xbf16, #tpu.memory_space<vmem>>, %arg3: memref<8x1xf32, #tpu.memory_space<vmem>>, %arg4: memref<4x16x32xbf16, #tpu.memory_space<vmem>>, %arg5: memref<16x1xf32, #tpu.memory_space<vmem>>, %arg6: memref<16x32x16xbf16, #tpu.memory_space<vmem>>, %arg7: memref<32x1xf32, #tpu.memory_space<vmem>>, %arg8: memref<16x8x32xbf16, #tpu.memory_space<vmem>>, %arg9: memref<8x1xf32, #tpu.memory_space<vmem>>, %arg10: memref<1x8x64xf32, #tpu.memory_space<vmem>>, %arg11: memref<1x16x16xf32, #tpu.memory_space<vmem>>, %arg12: memref<1x32x9xf32, #tpu.memory_space<vmem>>, %arg13: memref<1x1x4xf32, #tpu.memory_space<vmem>>, %arg14: memref<32x25xbf16, #tpu.memory_space<vmem>>, %arg15: memref<16x36xbf16, #tpu.memory_space<vmem>>, %arg16: memref<32x25xbf16, #tpu.memory_space<vmem>>) attributes {dimension_semantics = [#tpu.dimension_semantics<parallel>], iteration_bounds = array<i64: 2>, scalar_prefetch = 0 : i64, scratch_operands = 3 : i64, tpu.core_type = #tpu.core_type<tc>, window_params = [{transform_indices = @transform_0, window_bounds = array<i64: 1, 64, 64>}, {pipeline_mode = #tpu.pipeline_mode<synchronous>, transform_indices = @transform_1, window_bounds = array<i64: 8, 64>}, {pipeline_mode = #tpu.pipeline_mode<synchronous>, transform_indices = @transform_2, window_bounds = array<i64: 8, 1>}, {pipeline_mode = #tpu.pipeline_mode<synchronous>, transform_indices = @transform_3, window_bounds = array<i64: 4, 16, 32>}, {pipeline_mode = #tpu.pipeline_mode<synchronous>, transform_indices = @transform_4, window_bounds = array<i64: 16, 1>}, {pipeline_mode = #tpu.pipeline_mode<synchronous>, transform_indices = @transform_5, window_bounds = array<i64: 16, 32, 16>}, {pipeline_mode = #tpu.pipeline_mode<synchronous>, transform_indices = @transform_6, window_bounds = array<i64: 32, 1>}, {pipeline_mode = #tpu.pipeline_mode<synchronous>, transform_indices = @transform_7, window_bounds = array<i64: 16, 8, 32>}, {pipeline_mode = #tpu.pipeline_mode<synchronous>, transform_indices = @transform_8, window_bounds = array<i64: 8, 1>}, {transform_indices = @transform_9, window_bounds = array<i64: 1, 8, 64>}, {transform_indices = @transform_10, window_bounds = array<i64: 1, 16, 16>}, {transform_indices = @transform_11, window_bounds = array<i64: 1, 32, 9>}, {transform_indices = @transform_12, window_bounds = array<i64: 1, 1, 4>}]} {
    %cst = arith.constant 0.000000e+00 : bf16
    %0 = vector.broadcast %cst : bf16 to vector<32x25xbf16>
    %c0 = arith.constant 0 : index
    %c0_0 = arith.constant 0 : index
    %1 = vector.load %arg14[%c0, %c0_0] : memref<32x25xbf16, #tpu.memory_space<vmem>>, vector<32x25xbf16>
    tpu.vector_store %arg14[%c0, %c0_0], %0 {strides = array<i32>} : memref<32x25xbf16, #tpu.memory_space<vmem>>, vector<32x25xbf16>,
    %cst_1 = arith.constant 0.000000e+00 : bf16
    %2 = vector.broadcast %cst_1 : bf16 to vector<16x36xbf16>
    %c0_2 = arith.constant 0 : index
    %c0_3 = arith.constant 0 : index
    %3 = vector.load %arg15[%c0_2, %c0_3] : memref<16x36xbf16, #tpu.memory_space<vmem>>, vector<16x36xbf16>
    tpu.vector_store %arg15[%c0_2, %c0_3], %2 {strides = array<i32>} : memref<16x36xbf16, #tpu.memory_space<vmem>>, vector<16x36xbf16>,
    %cst_4 = arith.constant 0.000000e+00 : bf16
    %4 = vector.broadcast %cst_4 : bf16 to vector<32x25xbf16>
    %c0_5 = arith.constant 0 : index
    %c0_6 = arith.constant 0 : index
    %5 = vector.load %arg16[%c0_5, %c0_6] : memref<32x25xbf16, #tpu.memory_space<vmem>>, vector<32x25xbf16>
    tpu.vector_store %arg16[%c0_5, %c0_6], %4 {strides = array<i32>} : memref<32x25xbf16, #tpu.memory_space<vmem>>, vector<32x25xbf16>,
    %c0_7 = arith.constant 0 : index
    %c0_8 = arith.constant 0 : index
    %6 = vector.load %arg2[%c0_7, %c0_8] : memref<8x64xbf16, #tpu.memory_space<vmem>>, vector<8x64xbf16>
    %c0_9 = arith.constant 0 : index
    %c0_10 = arith.constant 0 : index
    %c0_11 = arith.constant 0 : index
    %7 = vector.load %arg1[%c0_9, %c0_10, %c0_11] : memref<1x64x64xbf16, #tpu.memory_space<vmem>>, vector<1x64x64xbf16>
    %8 = vector.shape_cast %7 : vector<1x64x64xbf16> to vector<64x64xbf16>
    %cst_12 = arith.constant dense<0.000000e+00> : vector<8x64xf32>
    %9 = tpu.matmul %6, %8, %cst_12 {dimension_numbers = #tpu.dot_dimension_numbers<[1], [0], [0], [1], [0, 0, 1, 1], [], []>} : vector<8x64xbf16>, vector<64x64xbf16>, vector<8x64xf32> -> vector<8x64xf32>
    %c0_13 = arith.constant 0 : index
    %c0_14 = arith.constant 0 : index
    %10 = vector.load %arg3[%c0_13, %c0_14] : memref<8x1xf32, #tpu.memory_space<vmem>>, vector<8x1xf32>
    %11 = vector.broadcast %10 : vector<8x1xf32> to vector<8x64xf32>
    %12 = arith.addf %9, %11 : vector<8x64xf32>
    %cst_15 = arith.constant 0.000000e+00 : f32
    %13 = vector.broadcast %cst_15 : f32 to vector<8x64xf32>
    %14 = arith.cmpf oge, %12, %13 : vector<8x64xf32>
    %cst_16 = arith.constant 2.000000e-01 : f32
    %15 = vector.broadcast %cst_16 : f32 to vector<8x64xf32>
    %16 = arith.mulf %15, %12 : vector<8x64xf32>
    %17 = arith.select %14, %12, %16 : vector<8x64xi1>, vector<8x64xf32>
    %c0_17 = arith.constant 0 : index
    %c0_18 = arith.constant 0 : index
    %c0_19 = arith.constant 0 : index
    %18 = vector.load %arg10[%c0_17, %c0_18, %c0_19] : memref<1x8x64xf32, #tpu.memory_space<vmem>>, vector<1x8x64xf32>
    %19 = vector.shape_cast %18 : vector<1x8x64xf32> to vector<8x64xf32>
    %20 = vector.shape_cast %17 : vector<8x64xf32> to vector<1x8x64xf32>
    tpu.vector_store %arg10[%c0_17, %c0_18, %c0_19], %20 {strides = array<i32>} : memref<1x8x64xf32, #tpu.memory_space<vmem>>, vector<1x8x64xf32>,
    %21 = arith.truncf %17 : vector<8x64xf32> to vector<8x64xbf16>
    %22 = vector.extract_strided_slice %21 {offsets = [0, 0], sizes = [8, 4], strides = [1, 1]} : vector<8x64xbf16> to vector<8x4xbf16>
    %c0_20 = arith.constant 0 : index
    %c0_21 = arith.constant 0 : index
    %23 = vector.load %arg14[%c0_20, %c0_21] : memref<32x25xbf16, #tpu.memory_space<vmem>>, vector<8x4xbf16>
    tpu.vector_store %arg14[%c0_20, %c0_21], %22 {strides = array<i32>} : memref<32x25xbf16, #tpu.memory_space<vmem>>, vector<8x4xbf16>,
    %24 = vector.extract_strided_slice %21 {offsets = [0, 4], sizes = [8, 4], strides = [1, 1]} : vector<8x64xbf16> to vector<8x4xbf16>
    %c0_22 = arith.constant 0 : index
    %c5 = arith.constant 5 : index
    %25 = vector.load %arg14[%c0_22, %c5] : memref<32x25xbf16, #tpu.memory_space<vmem>>, vector<8x4xbf16>
    tpu.vector_store %arg14[%c0_22, %c5], %24 {strides = array<i32>} : memref<32x25xbf16, #tpu.memory_space<vmem>>, vector<8x4xbf16>,
    %26 = vector.extract_strided_slice %21 {offsets = [0, 8], sizes = [8, 4], strides = [1, 1]} : vector<8x64xbf16> to vector<8x4xbf16>
    %c0_23 = arith.constant 0 : index
    %c10 = arith.constant 10 : index
    %27 = vector.load %arg14[%c0_23, %c10] : memref<32x25xbf16, #tpu.memory_space<vmem>>, vector<8x4xbf16>
    tpu.vector_store %arg14[%c0_23, %c10], %26 {strides = array<i32>} : memref<32x25xbf16, #tpu.memory_space<vmem>>, vector<8x4xbf16>,
    %28 = vector.extract_strided_slice %21 {offsets = [0, 12], sizes = [8, 4], strides = [1, 1]} : vector<8x64xbf16> to vector<8x4xbf16>
    %c0_24 = arith.constant 0 : index
    %c15 = arith.constant 15 : index
    %29 = vector.load %arg14[%c0_24, %c15] : memref<32x25xbf16, #tpu.memory_space<vmem>>, vector<8x4xbf16>
    tpu.vector_store %arg14[%c0_24, %c15], %28 {strides = array<i32>} : memref<32x25xbf16, #tpu.memory_space<vmem>>, vector<8x4xbf16>,
    %30 = vector.extract_strided_slice %21 {offsets = [0, 16], sizes = [8, 4], strides = [1, 1]} : vector<8x64xbf16> to vector<8x4xbf16>
    %c8 = arith.constant 8 : index
    %c1 = arith.constant 1 : index
    %31 = vector.load %arg14[%c8, %c1] : memref<32x25xbf16, #tpu.memory_space<vmem>>, vector<8x4xbf16>
    tpu.vector_store %arg14[%c8, %c1], %30 {strides = array<i32>} : memref<32x25xbf16, #tpu.memory_space<vmem>>, vector<8x4xbf16>,
    %32 = vector.extract_strided_slice %21 {offsets = [0, 20], sizes = [8, 4], strides = [1, 1]} : vector<8x64xbf16> to vector<8x4xbf16>
    %c8_25 = arith.constant 8 : index
    %c6 = arith.constant 6 : index
    %33 = vector.load %arg14[%c8_25, %c6] : memref<32x25xbf16, #tpu.memory_space<vmem>>, vector<8x4xbf16>
    tpu.vector_store %arg14[%c8_25, %c6], %32 {strides = array<i32>} : memref<32x25xbf16, #tpu.memory_space<vmem>>, vector<8x4xbf16>,
    %34 = vector.extract_strided_slice %21 {offsets = [0, 24], sizes = [8, 4], strides = [1, 1]} : vector<8x64xbf16> to vector<8x4xbf16>
    %c8_26 = arith.constant 8 : index
    %c11 = arith.constant 11 : index
    %35 = vector.load %arg14[%c8_26, %c11] : memref<32x25xbf16, #tpu.memory_space<vmem>>, vector<8x4xbf16>
    tpu.vector_store %arg14[%c8_26, %c11], %34 {strides = array<i32>} : memref<32x25xbf16, #tpu.memory_space<vmem>>, vector<8x4xbf16>,
    %36 = vector.extract_strided_slice %21 {offsets = [0, 28], sizes = [8, 4], strides = [1, 1]} : vector<8x64xbf16> to vector<8x4xbf16>
    %c8_27 = arith.constant 8 : index
    %c16 = arith.constant 16 : index
    %37 = vector.load %arg14[%c8_27, %c16] : memref<32x25xbf16, #tpu.memory_space<vmem>>, vector<8x4xbf16>
    tpu.vector_store %arg14[%c8_27, %c16], %36 {strides = array<i32>} : memref<32x25xbf16, #tpu.memory_space<vmem>>, vector<8x4xbf16>,
    %38 = vector.extract_strided_slice %21 {offsets = [0, 32], sizes = [8, 4], strides = [1, 1]} : vector<8x64xbf16> to vector<8x4xbf16>
    %c16_28 = arith.constant 16 : index
    %c5_29 = arith.constant 5 : index
    %39 = vector.load %arg14[%c16_28, %c5_29] : memref<32x25xbf16, #tpu.memory_space<vmem>>, vector<8x4xbf16>
    tpu.vector_store %arg14[%c16_28, %c5_29], %38 {strides = array<i32>} : memref<32x25xbf16, #tpu.memory_space<vmem>>, vector<8x4xbf16>,
    %40 = vector.extract_strided_slice %21 {offsets = [0, 36], sizes = [8, 4], strides = [1, 1]} : vector<8x64xbf16> to vector<8x4xbf16>
    %c16_30 = arith.constant 16 : index
    %c10_31 = arith.constant 10 : index
    %41 = vector.load %arg14[%c16_30, %c10_31] : memref<32x25xbf16, #tpu.memory_space<vmem>>, vector<8x4xbf16>
    tpu.vector_store %arg14[%c16_30, %c10_31], %40 {strides = array<i32>} : memref<32x25xbf16, #tpu.memory_space<vmem>>, vector<8x4xbf16>,
    %42 = vector.extract_strided_slice %21 {offsets = [0, 40], sizes = [8, 4], strides = [1, 1]} : vector<8x64xbf16> to vector<8x4xbf16>
    %c16_32 = arith.constant 16 : index
    %c15_33 = arith.constant 15 : index
    %43 = vector.load %arg14[%c16_32, %c15_33] : memref<32x25xbf16, #tpu.memory_space<vmem>>, vector<8x4xbf16>
    tpu.vector_store %arg14[%c16_32, %c15_33], %42 {strides = array<i32>} : memref<32x25xbf16, #tpu.memory_space<vmem>>, vector<8x4xbf16>,
    %44 = vector.extract_strided_slice %21 {offsets = [0, 44], sizes = [8, 4], strides = [1, 1]} : vector<8x64xbf16> to vector<8x4xbf16>
    %c16_34 = arith.constant 16 : index
    %c20 = arith.constant 20 : index
    %45 = vector.load %arg14[%c16_34, %c20] : memref<32x25xbf16, #tpu.memory_space<vmem>>, vector<8x4xbf16>
    tpu.vector_store %arg14[%c16_34, %c20], %44 {strides = array<i32>} : memref<32x25xbf16, #tpu.memory_space<vmem>>, vector<8x4xbf16>,
    %46 = vector.extract_strided_slice %21 {offsets = [0, 48], sizes = [8, 4], strides = [1, 1]} : vector<8x64xbf16> to vector<8x4xbf16>
    %c24 = arith.constant 24 : index
    %c6_35 = arith.constant 6 : index
    %47 = vector.load %arg14[%c24, %c6_35] : memref<32x25xbf16, #tpu.memory_space<vmem>>, vector<8x4xbf16>
    tpu.vector_store %arg14[%c24, %c6_35], %46 {strides = array<i32>} : memref<32x25xbf16, #tpu.memory_space<vmem>>, vector<8x4xbf16>,
    %48 = vector.extract_strided_slice %21 {offsets = [0, 52], sizes = [8, 4], strides = [1, 1]} : vector<8x64xbf16> to vector<8x4xbf16>
    %c24_36 = arith.constant 24 : index
    %c11_37 = arith.constant 11 : index
    %49 = vector.load %arg14[%c24_36, %c11_37] : memref<32x25xbf16, #tpu.memory_space<vmem>>, vector<8x4xbf16>
    tpu.vector_store %arg14[%c24_36, %c11_37], %48 {strides = array<i32>} : memref<32x25xbf16, #tpu.memory_space<vmem>>, vector<8x4xbf16>,
    %50 = vector.extract_strided_slice %21 {offsets = [0, 56], sizes = [8, 4], strides = [1, 1]} : vector<8x64xbf16> to vector<8x4xbf16>
    %c24_38 = arith.constant 24 : index
    %c16_39 = arith.constant 16 : index
    %51 = vector.load %arg14[%c24_38, %c16_39] : memref<32x25xbf16, #tpu.memory_space<vmem>>, vector<8x4xbf16>
    tpu.vector_store %arg14[%c24_38, %c16_39], %50 {strides = array<i32>} : memref<32x25xbf16, #tpu.memory_space<vmem>>, vector<8x4xbf16>,
    %52 = vector.extract_strided_slice %21 {offsets = [0, 60], sizes = [8, 4], strides = [1, 1]} : vector<8x64xbf16> to vector<8x4xbf16>
    %c24_40 = arith.constant 24 : index
    %c21 = arith.constant 21 : index
    %53 = vector.load %arg14[%c24_40, %c21] : memref<32x25xbf16, #tpu.memory_space<vmem>>, vector<8x4xbf16>
    tpu.vector_store %arg14[%c24_40, %c21], %52 {strides = array<i32>} : memref<32x25xbf16, #tpu.memory_space<vmem>>, vector<8x4xbf16>,
    %cst_41 = arith.constant 0.000000e+00 : f32
    %54 = vector.broadcast %cst_41 : f32 to vector<16x19xf32>
    %c0_42 = arith.constant 0 : index
    %c0_43 = arith.constant 0 : index
    %c0_44 = arith.constant 0 : index
    %55 = vector.load %arg4[%c0_42, %c0_43, %c0_44] : memref<4x16x32xbf16, #tpu.memory_space<vmem>>, vector<1x16x32xbf16>
    %56 = vector.shape_cast %55 : vector<1x16x32xbf16> to vector<16x32xbf16>
    %c0_45 = arith.constant 0 : index
    %c0_46 = arith.constant 0 : index
    %57 = vector.load %arg14[%c0_45, %c0_46] : memref<32x25xbf16, #tpu.memory_space<vmem>>, vector<32x19xbf16>
    %cst_47 = arith.constant dense<0.000000e+00> : vector<16x19xf32>
    %58 = tpu.matmul %56, %57, %cst_47 {dimension_numbers = #tpu.dot_dimension_numbers<[1], [0], [0], [1], [0, 0, 1, 1], [], []>} : vector<16x32xbf16>, vector<32x19xbf16>, vector<16x19xf32> -> vector<16x19xf32>
    %59 = arith.addf %54, %58 : vector<16x19xf32>
    %c1_48 = arith.constant 1 : index
    %c0_49 = arith.constant 0 : index
    %c0_50 = arith.constant 0 : index
    %60 = vector.load %arg4[%c1_48, %c0_49, %c0_50] : memref<4x16x32xbf16, #tpu.memory_space<vmem>>, vector<1x16x32xbf16>
    %61 = vector.shape_cast %60 : vector<1x16x32xbf16> to vector<16x32xbf16>
    %c0_51 = arith.constant 0 : index
    %c1_52 = arith.constant 1 : index
    %62 = vector.load %arg14[%c0_51, %c1_52] : memref<32x25xbf16, #tpu.memory_space<vmem>>, vector<32x19xbf16>
    %cst_53 = arith.constant dense<0.000000e+00> : vector<16x19xf32>
    %63 = tpu.matmul %61, %62, %cst_53 {dimension_numbers = #tpu.dot_dimension_numbers<[1], [0], [0], [1], [0, 0, 1, 1], [], []>} : vector<16x32xbf16>, vector<32x19xbf16>, vector<16x19xf32> -> vector<16x19xf32>
    %64 = arith.addf %59, %63 : vector<16x19xf32>
    %c2 = arith.constant 2 : index
    %c0_54 = arith.constant 0 : index
    %c0_55 = arith.constant 0 : index
    %65 = vector.load %arg4[%c2, %c0_54, %c0_55] : memref<4x16x32xbf16, #tpu.memory_space<vmem>>, vector<1x16x32xbf16>
    %66 = vector.shape_cast %65 : vector<1x16x32xbf16> to vector<16x32xbf16>
    %c0_56 = arith.constant 0 : index
    %c5_57 = arith.constant 5 : index
    %67 = vector.load %arg14[%c0_56, %c5_57] : memref<32x25xbf16, #tpu.memory_space<vmem>>, vector<32x19xbf16>
    %cst_58 = arith.constant dense<0.000000e+00> : vector<16x19xf32>
    %68 = tpu.matmul %66, %67, %cst_58 {dimension_numbers = #tpu.dot_dimension_numbers<[1], [0], [0], [1], [0, 0, 1, 1], [], []>} : vector<16x32xbf16>, vector<32x19xbf16>, vector<16x19xf32> -> vector<16x19xf32>
    %69 = arith.addf %64, %68 : vector<16x19xf32>
    %c3 = arith.constant 3 : index
    %c0_59 = arith.constant 0 : index
    %c0_60 = arith.constant 0 : index
    %70 = vector.load %arg4[%c3, %c0_59, %c0_60] : memref<4x16x32xbf16, #tpu.memory_space<vmem>>, vector<1x16x32xbf16>
    %71 = vector.shape_cast %70 : vector<1x16x32xbf16> to vector<16x32xbf16>
    %c0_61 = arith.constant 0 : index
    %c6_62 = arith.constant 6 : index
    %72 = vector.load %arg14[%c0_61, %c6_62] : memref<32x25xbf16, #tpu.memory_space<vmem>>, vector<32x19xbf16>
    %cst_63 = arith.constant dense<0.000000e+00> : vector<16x19xf32>
    %73 = tpu.matmul %71, %72, %cst_63 {dimension_numbers = #tpu.dot_dimension_numbers<[1], [0], [0], [1], [0, 0, 1, 1], [], []>} : vector<16x32xbf16>, vector<32x19xbf16>, vector<16x19xf32> -> vector<16x19xf32>
    %74 = arith.addf %69, %73 : vector<16x19xf32>
    %c0_64 = arith.constant 0 : index
    %c0_65 = arith.constant 0 : index
    %75 = vector.load %arg5[%c0_64, %c0_65] : memref<16x1xf32, #tpu.memory_space<vmem>>, vector<16x1xf32>
    %76 = vector.broadcast %75 : vector<16x1xf32> to vector<16x19xf32>
    %77 = arith.addf %74, %76 : vector<16x19xf32>
    %78 = tpu.iota {dimensions = array<i32: 1>} : vector<16x19xi32>
    %c5_i32 = arith.constant 5 : i32
    %c0_i32 = arith.constant 0 : i32
    %79 = arith.cmpi eq, %c5_i32, %c0_i32 : i32
    %c1_i32 = arith.constant 1 : i32
    %80 = arith.select %79, %c1_i32, %c5_i32 : i32
    %81 = vector.broadcast %80 : i32 to vector<16x19xi32>
    %82 = arith.remsi %78, %81 : vector<16x19xi32>
    %c0_i32_66 = arith.constant 0 : i32
    %83 = vector.broadcast %c0_i32_66 : i32 to vector<16x19xi32>
    %84 = arith.cmpi ne, %82, %83 : vector<16x19xi32>
    %c0_i32_67 = arith.constant 0 : i32
    %85 = vector.broadcast %c0_i32_67 : i32 to vector<16x19xi32>
    %86 = arith.cmpi slt, %82, %85 : vector<16x19xi32>
    %c0_i32_68 = arith.constant 0 : i32
    %87 = arith.cmpi slt, %80, %c0_i32_68 : i32
    %88 = vector.broadcast %87 : i1 to vector<16x19xi1>
    %89 = vector.broadcast %88 : vector<16x19xi1> to vector<16x19xi1>
    %90 = arith.xori %86, %89 : vector<16x19xi1>
    %91 = arith.andi %90, %84 : vector<16x19xi1>
    %92 = vector.broadcast %80 : i32 to vector<16x19xi32>
    %93 = arith.addi %82, %92 : vector<16x19xi32>
    %94 = arith.select %91, %93, %82 : vector<16x19xi1>, vector<16x19xi32>
    %c4_i32 = arith.constant 4 : i32
    %95 = vector.broadcast %c4_i32 : i32 to vector<16x19xi32>
    %96 = arith.cmpi slt, %94, %95 : vector<16x19xi32>
    %cst_69 = arith.constant 0.000000e+00 : f32
    %97 = vector.broadcast %cst_69 : f32 to vector<16x19xf32>
    %98 = arith.select %96, %77, %97 : vector<16x19xi1>, vector<16x19xf32>
    %cst_70 = arith.constant dense<0.000000e+00> : vector<16xf32>
    %99 = vector.multi_reduction <add>, %98, %cst_70 [1] : vector<16x19xf32> to vector<16xf32>
    %100 = vector.shape_cast %99 : vector<16xf32> to vector<16x1xf32>
    %cst_71 = arith.constant 6.250000e-02 : f32
    %101 = vector.broadcast %cst_71 : f32 to vector<16x1xf32>
    %102 = arith.mulf %100, %101 : vector<16x1xf32>
    %103 = vector.broadcast %102 : vector<16x1xf32> to vector<16x19xf32>
    %104 = arith.subf %77, %103 : vector<16x19xf32>
    %cst_72 = arith.constant 0.000000e+00 : f32
    %105 = vector.broadcast %cst_72 : f32 to vector<16x19xf32>
    %106 = arith.select %96, %104, %105 : vector<16x19xi1>, vector<16x19xf32>
    %107 = arith.mulf %106, %106 : vector<16x19xf32>
    %cst_73 = arith.constant dense<0.000000e+00> : vector<16xf32>
    %108 = vector.multi_reduction <add>, %107, %cst_73 [1] : vector<16x19xf32> to vector<16xf32>
    %109 = vector.shape_cast %108 : vector<16xf32> to vector<16x1xf32>
    %cst_74 = arith.constant 6.250000e-02 : f32
    %110 = vector.broadcast %cst_74 : f32 to vector<16x1xf32>
    %111 = arith.mulf %109, %110 : vector<16x1xf32>
    %112 = vector.broadcast %102 : vector<16x1xf32> to vector<16x19xf32>
    %113 = arith.subf %77, %112 : vector<16x19xf32>
    %cst_75 = arith.constant 9.99999974E-6 : f32
    %114 = vector.broadcast %cst_75 : f32 to vector<16x1xf32>
    %115 = arith.addf %111, %114 : vector<16x1xf32>
    %116 = math.rsqrt %115 : vector<16x1xf32>
    %117 = vector.broadcast %116 : vector<16x1xf32> to vector<16x19xf32>
    %118 = arith.mulf %113, %117 : vector<16x19xf32>
    %cst_76 = arith.constant 0.000000e+00 : f32
    %119 = vector.broadcast %cst_76 : f32 to vector<16x19xf32>
    %120 = arith.cmpf oge, %118, %119 : vector<16x19xf32>
    %cst_77 = arith.constant 2.000000e-01 : f32
    %121 = vector.broadcast %cst_77 : f32 to vector<16x19xf32>
    %122 = arith.mulf %121, %118 : vector<16x19xf32>
    %123 = arith.select %120, %118, %122 : vector<16x19xi1>, vector<16x19xf32>
    %124 = vector.extract_strided_slice %123 {offsets = [0, 0], sizes = [16, 4], strides = [1, 1]} : vector<16x19xf32> to vector<16x4xf32>
    %c0_78 = arith.constant 0 : index
    %c0_79 = arith.constant 0 : index
    %c0_80 = arith.constant 0 : index
    %125 = vector.load %arg11[%c0_78, %c0_79, %c0_80] : memref<1x16x16xf32, #tpu.memory_space<vmem>>, vector<1x16x4xf32>
    %126 = vector.shape_cast %125 : vector<1x16x4xf32> to vector<16x4xf32>
    %127 = vector.shape_cast %124 : vector<16x4xf32> to vector<1x16x4xf32>
    tpu.vector_store %arg11[%c0_78, %c0_79, %c0_80], %127 {strides = array<i32>} : memref<1x16x16xf32, #tpu.memory_space<vmem>>, vector<1x16x4xf32>,
    %128 = arith.truncf %124 : vector<16x4xf32> to vector<16x4xbf16>
    %c0_81 = arith.constant 0 : index
    %c7 = arith.constant 7 : index
    %129 = vector.load %arg15[%c0_81, %c7] : memref<16x36xbf16, #tpu.memory_space<vmem>>, vector<16x4xbf16>
    tpu.vector_store %arg15[%c0_81, %c7], %128 {strides = array<i32>} : memref<16x36xbf16, #tpu.memory_space<vmem>>, vector<16x4xbf16>,
    %130 = vector.extract_strided_slice %123 {offsets = [0, 5], sizes = [16, 4], strides = [1, 1]} : vector<16x19xf32> to vector<16x4xf32>
    %c0_82 = arith.constant 0 : index
    %c0_83 = arith.constant 0 : index
    %c4 = arith.constant 4 : index
    %131 = vector.load %arg11[%c0_82, %c0_83, %c4] : memref<1x16x16xf32, #tpu.memory_space<vmem>>, vector<1x16x4xf32>
    %132 = vector.shape_cast %131 : vector<1x16x4xf32> to vector<16x4xf32>
    %133 = vector.shape_cast %130 : vector<16x4xf32> to vector<1x16x4xf32>
    tpu.vector_store %arg11[%c0_82, %c0_83, %c4], %133 {strides = array<i32>} : memref<1x16x16xf32, #tpu.memory_space<vmem>>, vector<1x16x4xf32>,
    %134 = arith.truncf %130 : vector<16x4xf32> to vector<16x4xbf16>
    %c0_84 = arith.constant 0 : index
    %c13 = arith.constant 13 : index
    %135 = vector.load %arg15[%c0_84, %c13] : memref<16x36xbf16, #tpu.memory_space<vmem>>, vector<16x4xbf16>
    tpu.vector_store %arg15[%c0_84, %c13], %134 {strides = array<i32>} : memref<16x36xbf16, #tpu.memory_space<vmem>>, vector<16x4xbf16>,
    %136 = vector.extract_strided_slice %123 {offsets = [0, 10], sizes = [16, 4], strides = [1, 1]} : vector<16x19xf32> to vector<16x4xf32>
    %c0_85 = arith.constant 0 : index
    %c0_86 = arith.constant 0 : index
    %c8_87 = arith.constant 8 : index
    %137 = vector.load %arg11[%c0_85, %c0_86, %c8_87] : memref<1x16x16xf32, #tpu.memory_space<vmem>>, vector<1x16x4xf32>
    %138 = vector.shape_cast %137 : vector<1x16x4xf32> to vector<16x4xf32>
    %139 = vector.shape_cast %136 : vector<16x4xf32> to vector<1x16x4xf32>
    tpu.vector_store %arg11[%c0_85, %c0_86, %c8_87], %139 {strides = array<i32>} : memref<1x16x16xf32, #tpu.memory_space<vmem>>, vector<1x16x4xf32>,
    %140 = arith.truncf %136 : vector<16x4xf32> to vector<16x4xbf16>
    %c0_88 = arith.constant 0 : index
    %c19 = arith.constant 19 : index
    %141 = vector.load %arg15[%c0_88, %c19] : memref<16x36xbf16, #tpu.memory_space<vmem>>, vector<16x4xbf16>
    tpu.vector_store %arg15[%c0_88, %c19], %140 {strides = array<i32>} : memref<16x36xbf16, #tpu.memory_space<vmem>>, vector<16x4xbf16>,
    %142 = vector.extract_strided_slice %123 {offsets = [0, 15], sizes = [16, 4], strides = [1, 1]} : vector<16x19xf32> to vector<16x4xf32>
    %c0_89 = arith.constant 0 : index
    %c0_90 = arith.constant 0 : index
    %c12 = arith.constant 12 : index
    %143 = vector.load %arg11[%c0_89, %c0_90, %c12] : memref<1x16x16xf32, #tpu.memory_space<vmem>>, vector<1x16x4xf32>
    %144 = vector.shape_cast %143 : vector<1x16x4xf32> to vector<16x4xf32>
    %145 = vector.shape_cast %142 : vector<16x4xf32> to vector<1x16x4xf32>
    tpu.vector_store %arg11[%c0_89, %c0_90, %c12], %145 {strides = array<i32>} : memref<1x16x16xf32, #tpu.memory_space<vmem>>, vector<1x16x4xf32>,
    %146 = arith.truncf %142 : vector<16x4xf32> to vector<16x4xbf16>
    %c0_91 = arith.constant 0 : index
    %c25 = arith.constant 25 : index
    %147 = vector.load %arg15[%c0_91, %c25] : memref<16x36xbf16, #tpu.memory_space<vmem>>, vector<16x4xbf16>
    tpu.vector_store %arg15[%c0_91, %c25], %146 {strides = array<i32>} : memref<16x36xbf16, #tpu.memory_space<vmem>>, vector<16x4xbf16>,
    %cst_92 = arith.constant 0.000000e+00 : f32
    %148 = vector.broadcast %cst_92 : f32 to vector<32x15xf32>
    %c0_93 = arith.constant 0 : index
    %c0_94 = arith.constant 0 : index
    %c0_95 = arith.constant 0 : index
    %149 = vector.load %arg6[%c0_93, %c0_94, %c0_95] : memref<16x32x16xbf16, #tpu.memory_space<vmem>>, vector<1x32x16xbf16>
    %150 = vector.shape_cast %149 : vector<1x32x16xbf16> to vector<32x16xbf16>
    %c0_96 = arith.constant 0 : index
    %c0_97 = arith.constant 0 : index
    %151 = vector.load %arg15[%c0_96, %c0_97] : memref<16x36xbf16, #tpu.memory_space<vmem>>, vector<16x15xbf16>
    %cst_98 = arith.constant dense<0.000000e+00> : vector<32x15xf32>
    %152 = tpu.matmul %150, %151, %cst_98 {dimension_numbers = #tpu.dot_dimension_numbers<[1], [0], [0], [1], [0, 0, 1, 1], [], []>} : vector<32x16xbf16>, vector<16x15xbf16>, vector<32x15xf32> -> vector<32x15xf32>
    %153 = arith.addf %148, %152 : vector<32x15xf32>
    %c1_99 = arith.constant 1 : index
    %c0_100 = arith.constant 0 : index
    %c0_101 = arith.constant 0 : index
    %154 = vector.load %arg6[%c1_99, %c0_100, %c0_101] : memref<16x32x16xbf16, #tpu.memory_space<vmem>>, vector<1x32x16xbf16>
    %155 = vector.shape_cast %154 : vector<1x32x16xbf16> to vector<32x16xbf16>
    %c0_102 = arith.constant 0 : index
    %c1_103 = arith.constant 1 : index
    %156 = vector.load %arg15[%c0_102, %c1_103] : memref<16x36xbf16, #tpu.memory_space<vmem>>, vector<16x15xbf16>
    %cst_104 = arith.constant dense<0.000000e+00> : vector<32x15xf32>
    %157 = tpu.matmul %155, %156, %cst_104 {dimension_numbers = #tpu.dot_dimension_numbers<[1], [0], [0], [1], [0, 0, 1, 1], [], []>} : vector<32x16xbf16>, vector<16x15xbf16>, vector<32x15xf32> -> vector<32x15xf32>
    %158 = arith.addf %153, %157 : vector<32x15xf32>
    %c2_105 = arith.constant 2 : index
    %c0_106 = arith.constant 0 : index
    %c0_107 = arith.constant 0 : index
    %159 = vector.load %arg6[%c2_105, %c0_106, %c0_107] : memref<16x32x16xbf16, #tpu.memory_space<vmem>>, vector<1x32x16xbf16>
    %160 = vector.shape_cast %159 : vector<1x32x16xbf16> to vector<32x16xbf16>
    %c0_108 = arith.constant 0 : index
    %c2_109 = arith.constant 2 : index
    %161 = vector.load %arg15[%c0_108, %c2_109] : memref<16x36xbf16, #tpu.memory_space<vmem>>, vector<16x15xbf16>
    %cst_110 = arith.constant dense<0.000000e+00> : vector<32x15xf32>
    %162 = tpu.matmul %160, %161, %cst_110 {dimension_numbers = #tpu.dot_dimension_numbers<[1], [0], [0], [1], [0, 0, 1, 1], [], []>} : vector<32x16xbf16>, vector<16x15xbf16>, vector<32x15xf32> -> vector<32x15xf32>
    %163 = arith.addf %158, %162 : vector<32x15xf32>
    %c3_111 = arith.constant 3 : index
    %c0_112 = arith.constant 0 : index
    %c0_113 = arith.constant 0 : index
    %164 = vector.load %arg6[%c3_111, %c0_112, %c0_113] : memref<16x32x16xbf16, #tpu.memory_space<vmem>>, vector<1x32x16xbf16>
    %165 = vector.shape_cast %164 : vector<1x32x16xbf16> to vector<32x16xbf16>
    %c0_114 = arith.constant 0 : index
    %c3_115 = arith.constant 3 : index
    %166 = vector.load %arg15[%c0_114, %c3_115] : memref<16x36xbf16, #tpu.memory_space<vmem>>, vector<16x15xbf16>
    %cst_116 = arith.constant dense<0.000000e+00> : vector<32x15xf32>
    %167 = tpu.matmul %165, %166, %cst_116 {dimension_numbers = #tpu.dot_dimension_numbers<[1], [0], [0], [1], [0, 0, 1, 1], [], []>} : vector<32x16xbf16>, vector<16x15xbf16>, vector<32x15xf32> -> vector<32x15xf32>
    %168 = arith.addf %163, %167 : vector<32x15xf32>
    %c4_117 = arith.constant 4 : index
    %c0_118 = arith.constant 0 : index
    %c0_119 = arith.constant 0 : index
    %169 = vector.load %arg6[%c4_117, %c0_118, %c0_119] : memref<16x32x16xbf16, #tpu.memory_space<vmem>>, vector<1x32x16xbf16>
    %170 = vector.shape_cast %169 : vector<1x32x16xbf16> to vector<32x16xbf16>
    %c0_120 = arith.constant 0 : index
    %c6_121 = arith.constant 6 : index
    %171 = vector.load %arg15[%c0_120, %c6_121] : memref<16x36xbf16, #tpu.memory_space<vmem>>, vector<16x15xbf16>
    %cst_122 = arith.constant dense<0.000000e+00> : vector<32x15xf32>
    %172 = tpu.matmul %170, %171, %cst_122 {dimension_numbers = #tpu.dot_dimension_numbers<[1], [0], [0], [1], [0, 0, 1, 1], [], []>} : vector<32x16xbf16>, vector<16x15xbf16>, vector<32x15xf32> -> vector<32x15xf32>
    %173 = arith.addf %168, %172 : vector<32x15xf32>
    %c5_123 = arith.constant 5 : index
    %c0_124 = arith.constant 0 : index
    %c0_125 = arith.constant 0 : index
    %174 = vector.load %arg6[%c5_123, %c0_124, %c0_125] : memref<16x32x16xbf16, #tpu.memory_space<vmem>>, vector<1x32x16xbf16>
    %175 = vector.shape_cast %174 : vector<1x32x16xbf16> to vector<32x16xbf16>
    %c0_126 = arith.constant 0 : index
    %c7_127 = arith.constant 7 : index
    %176 = vector.load %arg15[%c0_126, %c7_127] : memref<16x36xbf16, #tpu.memory_space<vmem>>, vector<16x15xbf16>
    %cst_128 = arith.constant dense<0.000000e+00> : vector<32x15xf32>
    %177 = tpu.matmul %175, %176, %cst_128 {dimension_numbers = #tpu.dot_dimension_numbers<[1], [0], [0], [1], [0, 0, 1, 1], [], []>} : vector<32x16xbf16>, vector<16x15xbf16>, vector<32x15xf32> -> vector<32x15xf32>
    %178 = arith.addf %173, %177 : vector<32x15xf32>
    %c6_129 = arith.constant 6 : index
    %c0_130 = arith.constant 0 : index
    %c0_131 = arith.constant 0 : index
    %179 = vector.load %arg6[%c6_129, %c0_130, %c0_131] : memref<16x32x16xbf16, #tpu.memory_space<vmem>>, vector<1x32x16xbf16>
    %180 = vector.shape_cast %179 : vector<1x32x16xbf16> to vector<32x16xbf16>
    %c0_132 = arith.constant 0 : index
    %c8_133 = arith.constant 8 : index
    %181 = vector.load %arg15[%c0_132, %c8_133] : memref<16x36xbf16, #tpu.memory_space<vmem>>, vector<16x15xbf16>
    %cst_134 = arith.constant dense<0.000000e+00> : vector<32x15xf32>
    %182 = tpu.matmul %180, %181, %cst_134 {dimension_numbers = #tpu.dot_dimension_numbers<[1], [0], [0], [1], [0, 0, 1, 1], [], []>} : vector<32x16xbf16>, vector<16x15xbf16>, vector<32x15xf32> -> vector<32x15xf32>
    %183 = arith.addf %178, %182 : vector<32x15xf32>
    %c7_135 = arith.constant 7 : index
    %c0_136 = arith.constant 0 : index
    %c0_137 = arith.constant 0 : index
    %184 = vector.load %arg6[%c7_135, %c0_136, %c0_137] : memref<16x32x16xbf16, #tpu.memory_space<vmem>>, vector<1x32x16xbf16>
    %185 = vector.shape_cast %184 : vector<1x32x16xbf16> to vector<32x16xbf16>
    %c0_138 = arith.constant 0 : index
    %c9 = arith.constant 9 : index
    %186 = vector.load %arg15[%c0_138, %c9] : memref<16x36xbf16, #tpu.memory_space<vmem>>, vector<16x15xbf16>
    %cst_139 = arith.constant dense<0.000000e+00> : vector<32x15xf32>
    %187 = tpu.matmul %185, %186, %cst_139 {dimension_numbers = #tpu.dot_dimension_numbers<[1], [0], [0], [1], [0, 0, 1, 1], [], []>} : vector<32x16xbf16>, vector<16x15xbf16>, vector<32x15xf32> -> vector<32x15xf32>
    %188 = arith.addf %183, %187 : vector<32x15xf32>
    %c8_140 = arith.constant 8 : index
    %c0_141 = arith.constant 0 : index
    %c0_142 = arith.constant 0 : index
    %189 = vector.load %arg6[%c8_140, %c0_141, %c0_142] : memref<16x32x16xbf16, #tpu.memory_space<vmem>>, vector<1x32x16xbf16>
    %190 = vector.shape_cast %189 : vector<1x32x16xbf16> to vector<32x16xbf16>
    %c0_143 = arith.constant 0 : index
    %c12_144 = arith.constant 12 : index
    %191 = vector.load %arg15[%c0_143, %c12_144] : memref<16x36xbf16, #tpu.memory_space<vmem>>, vector<16x15xbf16>
    %cst_145 = arith.constant dense<0.000000e+00> : vector<32x15xf32>
    %192 = tpu.matmul %190, %191, %cst_145 {dimension_numbers = #tpu.dot_dimension_numbers<[1], [0], [0], [1], [0, 0, 1, 1], [], []>} : vector<32x16xbf16>, vector<16x15xbf16>, vector<32x15xf32> -> vector<32x15xf32>
    %193 = arith.addf %188, %192 : vector<32x15xf32>
    %c9_146 = arith.constant 9 : index
    %c0_147 = arith.constant 0 : index
    %c0_148 = arith.constant 0 : index
    %194 = vector.load %arg6[%c9_146, %c0_147, %c0_148] : memref<16x32x16xbf16, #tpu.memory_space<vmem>>, vector<1x32x16xbf16>
    %195 = vector.shape_cast %194 : vector<1x32x16xbf16> to vector<32x16xbf16>
    %c0_149 = arith.constant 0 : index
    %c13_150 = arith.constant 13 : index
    %196 = vector.load %arg15[%c0_149, %c13_150] : memref<16x36xbf16, #tpu.memory_space<vmem>>, vector<16x15xbf16>
    %cst_151 = arith.constant dense<0.000000e+00> : vector<32x15xf32>
    %197 = tpu.matmul %195, %196, %cst_151 {dimension_numbers = #tpu.dot_dimension_numbers<[1], [0], [0], [1], [0, 0, 1, 1], [], []>} : vector<32x16xbf16>, vector<16x15xbf16>, vector<32x15xf32> -> vector<32x15xf32>
    %198 = arith.addf %193, %197 : vector<32x15xf32>
    %c10_152 = arith.constant 10 : index
    %c0_153 = arith.constant 0 : index
    %c0_154 = arith.constant 0 : index
    %199 = vector.load %arg6[%c10_152, %c0_153, %c0_154] : memref<16x32x16xbf16, #tpu.memory_space<vmem>>, vector<1x32x16xbf16>
    %200 = vector.shape_cast %199 : vector<1x32x16xbf16> to vector<32x16xbf16>
    %c0_155 = arith.constant 0 : index
    %c14 = arith.constant 14 : index
    %201 = vector.load %arg15[%c0_155, %c14] : memref<16x36xbf16, #tpu.memory_space<vmem>>, vector<16x15xbf16>
    %cst_156 = arith.constant dense<0.000000e+00> : vector<32x15xf32>
    %202 = tpu.matmul %200, %201, %cst_156 {dimension_numbers = #tpu.dot_dimension_numbers<[1], [0], [0], [1], [0, 0, 1, 1], [], []>} : vector<32x16xbf16>, vector<16x15xbf16>, vector<32x15xf32> -> vector<32x15xf32>
    %203 = arith.addf %198, %202 : vector<32x15xf32>
    %c11_157 = arith.constant 11 : index
    %c0_158 = arith.constant 0 : index
    %c0_159 = arith.constant 0 : index
    %204 = vector.load %arg6[%c11_157, %c0_158, %c0_159] : memref<16x32x16xbf16, #tpu.memory_space<vmem>>, vector<1x32x16xbf16>
    %205 = vector.shape_cast %204 : vector<1x32x16xbf16> to vector<32x16xbf16>
    %c0_160 = arith.constant 0 : index
    %c15_161 = arith.constant 15 : index
    %206 = vector.load %arg15[%c0_160, %c15_161] : memref<16x36xbf16, #tpu.memory_space<vmem>>, vector<16x15xbf16>
    %cst_162 = arith.constant dense<0.000000e+00> : vector<32x15xf32>
    %207 = tpu.matmul %205, %206, %cst_162 {dimension_numbers = #tpu.dot_dimension_numbers<[1], [0], [0], [1], [0, 0, 1, 1], [], []>} : vector<32x16xbf16>, vector<16x15xbf16>, vector<32x15xf32> -> vector<32x15xf32>
    %208 = arith.addf %203, %207 : vector<32x15xf32>
    %c12_163 = arith.constant 12 : index
    %c0_164 = arith.constant 0 : index
    %c0_165 = arith.constant 0 : index
    %209 = vector.load %arg6[%c12_163, %c0_164, %c0_165] : memref<16x32x16xbf16, #tpu.memory_space<vmem>>, vector<1x32x16xbf16>
    %210 = vector.shape_cast %209 : vector<1x32x16xbf16> to vector<32x16xbf16>
    %c0_166 = arith.constant 0 : index
    %c18 = arith.constant 18 : index
    %211 = vector.load %arg15[%c0_166, %c18] : memref<16x36xbf16, #tpu.memory_space<vmem>>, vector<16x15xbf16>
    %cst_167 = arith.constant dense<0.000000e+00> : vector<32x15xf32>
    %212 = tpu.matmul %210, %211, %cst_167 {dimension_numbers = #tpu.dot_dimension_numbers<[1], [0], [0], [1], [0, 0, 1, 1], [], []>} : vector<32x16xbf16>, vector<16x15xbf16>, vector<32x15xf32> -> vector<32x15xf32>
    %213 = arith.addf %208, %212 : vector<32x15xf32>
    %c13_168 = arith.constant 13 : index
    %c0_169 = arith.constant 0 : index
    %c0_170 = arith.constant 0 : index
    %214 = vector.load %arg6[%c13_168, %c0_169, %c0_170] : memref<16x32x16xbf16, #tpu.memory_space<vmem>>, vector<1x32x16xbf16>
    %215 = vector.shape_cast %214 : vector<1x32x16xbf16> to vector<32x16xbf16>
    %c0_171 = arith.constant 0 : index
    %c19_172 = arith.constant 19 : index
    %216 = vector.load %arg15[%c0_171, %c19_172] : memref<16x36xbf16, #tpu.memory_space<vmem>>, vector<16x15xbf16>
    %cst_173 = arith.constant dense<0.000000e+00> : vector<32x15xf32>
    %217 = tpu.matmul %215, %216, %cst_173 {dimension_numbers = #tpu.dot_dimension_numbers<[1], [0], [0], [1], [0, 0, 1, 1], [], []>} : vector<32x16xbf16>, vector<16x15xbf16>, vector<32x15xf32> -> vector<32x15xf32>
    %218 = arith.addf %213, %217 : vector<32x15xf32>
    %c14_174 = arith.constant 14 : index
    %c0_175 = arith.constant 0 : index
    %c0_176 = arith.constant 0 : index
    %219 = vector.load %arg6[%c14_174, %c0_175, %c0_176] : memref<16x32x16xbf16, #tpu.memory_space<vmem>>, vector<1x32x16xbf16>
    %220 = vector.shape_cast %219 : vector<1x32x16xbf16> to vector<32x16xbf16>
    %c0_177 = arith.constant 0 : index
    %c20_178 = arith.constant 20 : index
    %221 = vector.load %arg15[%c0_177, %c20_178] : memref<16x36xbf16, #tpu.memory_space<vmem>>, vector<16x15xbf16>
    %cst_179 = arith.constant dense<0.000000e+00> : vector<32x15xf32>
    %222 = tpu.matmul %220, %221, %cst_179 {dimension_numbers = #tpu.dot_dimension_numbers<[1], [0], [0], [1], [0, 0, 1, 1], [], []>} : vector<32x16xbf16>, vector<16x15xbf16>, vector<32x15xf32> -> vector<32x15xf32>
    %223 = arith.addf %218, %222 : vector<32x15xf32>
    %c15_180 = arith.constant 15 : index
    %c0_181 = arith.constant 0 : index
    %c0_182 = arith.constant 0 : index
    %224 = vector.load %arg6[%c15_180, %c0_181, %c0_182] : memref<16x32x16xbf16, #tpu.memory_space<vmem>>, vector<1x32x16xbf16>
    %225 = vector.shape_cast %224 : vector<1x32x16xbf16> to vector<32x16xbf16>
    %c0_183 = arith.constant 0 : index
    %c21_184 = arith.constant 21 : index
    %226 = vector.load %arg15[%c0_183, %c21_184] : memref<16x36xbf16, #tpu.memory_space<vmem>>, vector<16x15xbf16>
    %cst_185 = arith.constant dense<0.000000e+00> : vector<32x15xf32>
    %227 = tpu.matmul %225, %226, %cst_185 {dimension_numbers = #tpu.dot_dimension_numbers<[1], [0], [0], [1], [0, 0, 1, 1], [], []>} : vector<32x16xbf16>, vector<16x15xbf16>, vector<32x15xf32> -> vector<32x15xf32>
    %228 = arith.addf %223, %227 : vector<32x15xf32>
    %c0_186 = arith.constant 0 : index
    %c0_187 = arith.constant 0 : index
    %229 = vector.load %arg7[%c0_186, %c0_187] : memref<32x1xf32, #tpu.memory_space<vmem>>, vector<32x1xf32>
    %230 = vector.broadcast %229 : vector<32x1xf32> to vector<32x15xf32>
    %231 = arith.addf %228, %230 : vector<32x15xf32>
    %232 = tpu.iota {dimensions = array<i32: 1>} : vector<32x15xi32>
    %c6_i32 = arith.constant 6 : i32
    %c0_i32_188 = arith.constant 0 : i32
    %233 = arith.cmpi eq, %c6_i32, %c0_i32_188 : i32
    %c1_i32_189 = arith.constant 1 : i32
    %234 = arith.select %233, %c1_i32_189, %c6_i32 : i32
    %235 = vector.broadcast %234 : i32 to vector<32x15xi32>
    %236 = arith.remsi %232, %235 : vector<32x15xi32>
    %c0_i32_190 = arith.constant 0 : i32
    %237 = vector.broadcast %c0_i32_190 : i32 to vector<32x15xi32>
    %238 = arith.cmpi ne, %236, %237 : vector<32x15xi32>
    %c0_i32_191 = arith.constant 0 : i32
    %239 = vector.broadcast %c0_i32_191 : i32 to vector<32x15xi32>
    %240 = arith.cmpi slt, %236, %239 : vector<32x15xi32>
    %c0_i32_192 = arith.constant 0 : i32
    %241 = arith.cmpi slt, %234, %c0_i32_192 : i32
    %242 = vector.broadcast %241 : i1 to vector<32x15xi1>
    %243 = vector.broadcast %242 : vector<32x15xi1> to vector<32x15xi1>
    %244 = arith.xori %240, %243 : vector<32x15xi1>
    %245 = arith.andi %244, %238 : vector<32x15xi1>
    %246 = vector.broadcast %234 : i32 to vector<32x15xi32>
    %247 = arith.addi %236, %246 : vector<32x15xi32>
    %248 = arith.select %245, %247, %236 : vector<32x15xi1>, vector<32x15xi32>
    %c3_i32 = arith.constant 3 : i32
    %249 = vector.broadcast %c3_i32 : i32 to vector<32x15xi32>
    %250 = arith.cmpi slt, %248, %249 : vector<32x15xi32>
    %cst_193 = arith.constant 0.000000e+00 : f32
    %251 = vector.broadcast %cst_193 : f32 to vector<32x15xf32>
    %252 = arith.select %250, %231, %251 : vector<32x15xi1>, vector<32x15xf32>
    %cst_194 = arith.constant dense<0.000000e+00> : vector<32xf32>
    %253 = vector.multi_reduction <add>, %252, %cst_194 [1] : vector<32x15xf32> to vector<32xf32>
    %254 = vector.shape_cast %253 : vector<32xf32> to vector<32x1xf32>
    %cst_195 = arith.constant 0.111111112 : f32
    %255 = vector.broadcast %cst_195 : f32 to vector<32x1xf32>
    %256 = arith.mulf %254, %255 : vector<32x1xf32>
    %257 = vector.broadcast %256 : vector<32x1xf32> to vector<32x15xf32>
    %258 = arith.subf %231, %257 : vector<32x15xf32>
    %cst_196 = arith.constant 0.000000e+00 : f32
    %259 = vector.broadcast %cst_196 : f32 to vector<32x15xf32>
    %260 = arith.select %250, %258, %259 : vector<32x15xi1>, vector<32x15xf32>
    %261 = arith.mulf %260, %260 : vector<32x15xf32>
    %cst_197 = arith.constant dense<0.000000e+00> : vector<32xf32>
    %262 = vector.multi_reduction <add>, %261, %cst_197 [1] : vector<32x15xf32> to vector<32xf32>
    %263 = vector.shape_cast %262 : vector<32xf32> to vector<32x1xf32>
    %cst_198 = arith.constant 0.111111112 : f32
    %264 = vector.broadcast %cst_198 : f32 to vector<32x1xf32>
    %265 = arith.mulf %263, %264 : vector<32x1xf32>
    %266 = vector.broadcast %256 : vector<32x1xf32> to vector<32x15xf32>
    %267 = arith.subf %231, %266 : vector<32x15xf32>
    %cst_199 = arith.constant 9.99999974E-6 : f32
    %268 = vector.broadcast %cst_199 : f32 to vector<32x1xf32>
    %269 = arith.addf %265, %268 : vector<32x1xf32>
    %270 = math.rsqrt %269 : vector<32x1xf32>
    %271 = vector.broadcast %270 : vector<32x1xf32> to vector<32x15xf32>
    %272 = arith.mulf %267, %271 : vector<32x15xf32>
    %cst_200 = arith.constant 0.000000e+00 : f32
    %273 = vector.broadcast %cst_200 : f32 to vector<32x15xf32>
    %274 = arith.cmpf oge, %272, %273 : vector<32x15xf32>
    %cst_201 = arith.constant 2.000000e-01 : f32
    %275 = vector.broadcast %cst_201 : f32 to vector<32x15xf32>
    %276 = arith.mulf %275, %272 : vector<32x15xf32>
    %277 = arith.select %274, %272, %276 : vector<32x15xi1>, vector<32x15xf32>
    %278 = vector.extract_strided_slice %277 {offsets = [0, 0], sizes = [32, 3], strides = [1, 1]} : vector<32x15xf32> to vector<32x3xf32>
    %c0_202 = arith.constant 0 : index
    %c0_203 = arith.constant 0 : index
    %c0_204 = arith.constant 0 : index
    %279 = vector.load %arg12[%c0_202, %c0_203, %c0_204] : memref<1x32x9xf32, #tpu.memory_space<vmem>>, vector<1x32x3xf32>
    %280 = vector.shape_cast %279 : vector<1x32x3xf32> to vector<32x3xf32>
    %281 = vector.shape_cast %278 : vector<32x3xf32> to vector<1x32x3xf32>
    tpu.vector_store %arg12[%c0_202, %c0_203, %c0_204], %281 {strides = array<i32>} : memref<1x32x9xf32, #tpu.memory_space<vmem>>, vector<1x32x3xf32>,
    %282 = arith.truncf %278 : vector<32x3xf32> to vector<32x3xbf16>
    %c0_205 = arith.constant 0 : index
    %c6_206 = arith.constant 6 : index
    %283 = vector.load %arg16[%c0_205, %c6_206] : memref<32x25xbf16, #tpu.memory_space<vmem>>, vector<32x3xbf16>
    tpu.vector_store %arg16[%c0_205, %c6_206], %282 {strides = array<i32>} : memref<32x25xbf16, #tpu.memory_space<vmem>>, vector<32x3xbf16>,
    %284 = vector.extract_strided_slice %277 {offsets = [0, 6], sizes = [32, 3], strides = [1, 1]} : vector<32x15xf32> to vector<32x3xf32>
    %c0_207 = arith.constant 0 : index
    %c0_208 = arith.constant 0 : index
    %c3_209 = arith.constant 3 : index
    %285 = vector.load %arg12[%c0_207, %c0_208, %c3_209] : memref<1x32x9xf32, #tpu.memory_space<vmem>>, vector<1x32x3xf32>
    %286 = vector.shape_cast %285 : vector<1x32x3xf32> to vector<32x3xf32>
    %287 = vector.shape_cast %284 : vector<32x3xf32> to vector<1x32x3xf32>
    tpu.vector_store %arg12[%c0_207, %c0_208, %c3_209], %287 {strides = array<i32>} : memref<1x32x9xf32, #tpu.memory_space<vmem>>, vector<1x32x3xf32>,
    %288 = arith.truncf %284 : vector<32x3xf32> to vector<32x3xbf16>
    %c0_210 = arith.constant 0 : index
    %c11_211 = arith.constant 11 : index
    %289 = vector.load %arg16[%c0_210, %c11_211] : memref<32x25xbf16, #tpu.memory_space<vmem>>, vector<32x3xbf16>
    tpu.vector_store %arg16[%c0_210, %c11_211], %288 {strides = array<i32>} : memref<32x25xbf16, #tpu.memory_space<vmem>>, vector<32x3xbf16>,
    %290 = vector.extract_strided_slice %277 {offsets = [0, 12], sizes = [32, 3], strides = [1, 1]} : vector<32x15xf32> to vector<32x3xf32>
    %c0_212 = arith.constant 0 : index
    %c0_213 = arith.constant 0 : index
    %c6_214 = arith.constant 6 : index
    %291 = vector.load %arg12[%c0_212, %c0_213, %c6_214] : memref<1x32x9xf32, #tpu.memory_space<vmem>>, vector<1x32x3xf32>
    %292 = vector.shape_cast %291 : vector<1x32x3xf32> to vector<32x3xf32>
    %293 = vector.shape_cast %290 : vector<32x3xf32> to vector<1x32x3xf32>
    tpu.vector_store %arg12[%c0_212, %c0_213, %c6_214], %293 {strides = array<i32>} : memref<1x32x9xf32, #tpu.memory_space<vmem>>, vector<1x32x3xf32>,
    %294 = arith.truncf %290 : vector<32x3xf32> to vector<32x3xbf16>
    %c0_215 = arith.constant 0 : index
    %c16_216 = arith.constant 16 : index
    %295 = vector.load %arg16[%c0_215, %c16_216] : memref<32x25xbf16, #tpu.memory_space<vmem>>, vector<32x3xbf16>
    tpu.vector_store %arg16[%c0_215, %c16_216], %294 {strides = array<i32>} : memref<32x25xbf16, #tpu.memory_space<vmem>>, vector<32x3xbf16>,
    %cst_217 = arith.constant 0.000000e+00 : f32
    %296 = vector.broadcast %cst_217 : f32 to vector<8x7xf32>
    %c0_218 = arith.constant 0 : index
    %c0_219 = arith.constant 0 : index
    %c0_220 = arith.constant 0 : index
    %297 = vector.load %arg8[%c0_218, %c0_219, %c0_220] : memref<16x8x32xbf16, #tpu.memory_space<vmem>>, vector<1x8x32xbf16>
    %298 = vector.shape_cast %297 : vector<1x8x32xbf16> to vector<8x32xbf16>
    %c0_221 = arith.constant 0 : index
    %c0_222 = arith.constant 0 : index
    %299 = vector.load %arg16[%c0_221, %c0_222] : memref<32x25xbf16, #tpu.memory_space<vmem>>, vector<32x7xbf16>
    %cst_223 = arith.constant dense<0.000000e+00> : vector<8x7xf32>
    %300 = tpu.matmul %298, %299, %cst_223 {dimension_numbers = #tpu.dot_dimension_numbers<[1], [0], [0], [1], [0, 0, 1, 1], [], []>} : vector<8x32xbf16>, vector<32x7xbf16>, vector<8x7xf32> -> vector<8x7xf32>
    %301 = arith.addf %296, %300 : vector<8x7xf32>
    %c1_224 = arith.constant 1 : index
    %c0_225 = arith.constant 0 : index
    %c0_226 = arith.constant 0 : index
    %302 = vector.load %arg8[%c1_224, %c0_225, %c0_226] : memref<16x8x32xbf16, #tpu.memory_space<vmem>>, vector<1x8x32xbf16>
    %303 = vector.shape_cast %302 : vector<1x8x32xbf16> to vector<8x32xbf16>
    %c0_227 = arith.constant 0 : index
    %c1_228 = arith.constant 1 : index
    %304 = vector.load %arg16[%c0_227, %c1_228] : memref<32x25xbf16, #tpu.memory_space<vmem>>, vector<32x7xbf16>
    %cst_229 = arith.constant dense<0.000000e+00> : vector<8x7xf32>
    %305 = tpu.matmul %303, %304, %cst_229 {dimension_numbers = #tpu.dot_dimension_numbers<[1], [0], [0], [1], [0, 0, 1, 1], [], []>} : vector<8x32xbf16>, vector<32x7xbf16>, vector<8x7xf32> -> vector<8x7xf32>
    %306 = arith.addf %301, %305 : vector<8x7xf32>
    %c2_230 = arith.constant 2 : index
    %c0_231 = arith.constant 0 : index
    %c0_232 = arith.constant 0 : index
    %307 = vector.load %arg8[%c2_230, %c0_231, %c0_232] : memref<16x8x32xbf16, #tpu.memory_space<vmem>>, vector<1x8x32xbf16>
    %308 = vector.shape_cast %307 : vector<1x8x32xbf16> to vector<8x32xbf16>
    %c0_233 = arith.constant 0 : index
    %c2_234 = arith.constant 2 : index
    %309 = vector.load %arg16[%c0_233, %c2_234] : memref<32x25xbf16, #tpu.memory_space<vmem>>, vector<32x7xbf16>
    %cst_235 = arith.constant dense<0.000000e+00> : vector<8x7xf32>
    %310 = tpu.matmul %308, %309, %cst_235 {dimension_numbers = #tpu.dot_dimension_numbers<[1], [0], [0], [1], [0, 0, 1, 1], [], []>} : vector<8x32xbf16>, vector<32x7xbf16>, vector<8x7xf32> -> vector<8x7xf32>
    %311 = arith.addf %306, %310 : vector<8x7xf32>
    %c3_236 = arith.constant 3 : index
    %c0_237 = arith.constant 0 : index
    %c0_238 = arith.constant 0 : index
    %312 = vector.load %arg8[%c3_236, %c0_237, %c0_238] : memref<16x8x32xbf16, #tpu.memory_space<vmem>>, vector<1x8x32xbf16>
    %313 = vector.shape_cast %312 : vector<1x8x32xbf16> to vector<8x32xbf16>
    %c0_239 = arith.constant 0 : index
    %c3_240 = arith.constant 3 : index
    %314 = vector.load %arg16[%c0_239, %c3_240] : memref<32x25xbf16, #tpu.memory_space<vmem>>, vector<32x7xbf16>
    %cst_241 = arith.constant dense<0.000000e+00> : vector<8x7xf32>
    %315 = tpu.matmul %313, %314, %cst_241 {dimension_numbers = #tpu.dot_dimension_numbers<[1], [0], [0], [1], [0, 0, 1, 1], [], []>} : vector<8x32xbf16>, vector<32x7xbf16>, vector<8x7xf32> -> vector<8x7xf32>
    %316 = arith.addf %311, %315 : vector<8x7xf32>
    %c4_242 = arith.constant 4 : index
    %c0_243 = arith.constant 0 : index
    %c0_244 = arith.constant 0 : index
    %317 = vector.load %arg8[%c4_242, %c0_243, %c0_244] : memref<16x8x32xbf16, #tpu.memory_space<vmem>>, vector<1x8x32xbf16>
    %318 = vector.shape_cast %317 : vector<1x8x32xbf16> to vector<8x32xbf16>
    %c0_245 = arith.constant 0 : index
    %c5_246 = arith.constant 5 : index
    %319 = vector.load %arg16[%c0_245, %c5_246] : memref<32x25xbf16, #tpu.memory_space<vmem>>, vector<32x7xbf16>
    %cst_247 = arith.constant dense<0.000000e+00> : vector<8x7xf32>
    %320 = tpu.matmul %318, %319, %cst_247 {dimension_numbers = #tpu.dot_dimension_numbers<[1], [0], [0], [1], [0, 0, 1, 1], [], []>} : vector<8x32xbf16>, vector<32x7xbf16>, vector<8x7xf32> -> vector<8x7xf32>
    %321 = arith.addf %316, %320 : vector<8x7xf32>
    %c5_248 = arith.constant 5 : index
    %c0_249 = arith.constant 0 : index
    %c0_250 = arith.constant 0 : index
    %322 = vector.load %arg8[%c5_248, %c0_249, %c0_250] : memref<16x8x32xbf16, #tpu.memory_space<vmem>>, vector<1x8x32xbf16>
    %323 = vector.shape_cast %322 : vector<1x8x32xbf16> to vector<8x32xbf16>
    %c0_251 = arith.constant 0 : index
    %c6_252 = arith.constant 6 : index
    %324 = vector.load %arg16[%c0_251, %c6_252] : memref<32x25xbf16, #tpu.memory_space<vmem>>, vector<32x7xbf16>
    %cst_253 = arith.constant dense<0.000000e+00> : vector<8x7xf32>
    %325 = tpu.matmul %323, %324, %cst_253 {dimension_numbers = #tpu.dot_dimension_numbers<[1], [0], [0], [1], [0, 0, 1, 1], [], []>} : vector<8x32xbf16>, vector<32x7xbf16>, vector<8x7xf32> -> vector<8x7xf32>
    %326 = arith.addf %321, %325 : vector<8x7xf32>
    %c6_254 = arith.constant 6 : index
    %c0_255 = arith.constant 0 : index
    %c0_256 = arith.constant 0 : index
    %327 = vector.load %arg8[%c6_254, %c0_255, %c0_256] : memref<16x8x32xbf16, #tpu.memory_space<vmem>>, vector<1x8x32xbf16>
    %328 = vector.shape_cast %327 : vector<1x8x32xbf16> to vector<8x32xbf16>
    %c0_257 = arith.constant 0 : index
    %c7_258 = arith.constant 7 : index
    %329 = vector.load %arg16[%c0_257, %c7_258] : memref<32x25xbf16, #tpu.memory_space<vmem>>, vector<32x7xbf16>
    %cst_259 = arith.constant dense<0.000000e+00> : vector<8x7xf32>
    %330 = tpu.matmul %328, %329, %cst_259 {dimension_numbers = #tpu.dot_dimension_numbers<[1], [0], [0], [1], [0, 0, 1, 1], [], []>} : vector<8x32xbf16>, vector<32x7xbf16>, vector<8x7xf32> -> vector<8x7xf32>
    %331 = arith.addf %326, %330 : vector<8x7xf32>
    %c7_260 = arith.constant 7 : index
    %c0_261 = arith.constant 0 : index
    %c0_262 = arith.constant 0 : index
    %332 = vector.load %arg8[%c7_260, %c0_261, %c0_262] : memref<16x8x32xbf16, #tpu.memory_space<vmem>>, vector<1x8x32xbf16>
    %333 = vector.shape_cast %332 : vector<1x8x32xbf16> to vector<8x32xbf16>
    %c0_263 = arith.constant 0 : index
    %c8_264 = arith.constant 8 : index
    %334 = vector.load %arg16[%c0_263, %c8_264] : memref<32x25xbf16, #tpu.memory_space<vmem>>, vector<32x7xbf16>
    %cst_265 = arith.constant dense<0.000000e+00> : vector<8x7xf32>
    %335 = tpu.matmul %333, %334, %cst_265 {dimension_numbers = #tpu.dot_dimension_numbers<[1], [0], [0], [1], [0, 0, 1, 1], [], []>} : vector<8x32xbf16>, vector<32x7xbf16>, vector<8x7xf32> -> vector<8x7xf32>
    %336 = arith.addf %331, %335 : vector<8x7xf32>
    %c8_266 = arith.constant 8 : index
    %c0_267 = arith.constant 0 : index
    %c0_268 = arith.constant 0 : index
    %337 = vector.load %arg8[%c8_266, %c0_267, %c0_268] : memref<16x8x32xbf16, #tpu.memory_space<vmem>>, vector<1x8x32xbf16>
    %338 = vector.shape_cast %337 : vector<1x8x32xbf16> to vector<8x32xbf16>
    %c0_269 = arith.constant 0 : index
    %c10_270 = arith.constant 10 : index
    %339 = vector.load %arg16[%c0_269, %c10_270] : memref<32x25xbf16, #tpu.memory_space<vmem>>, vector<32x7xbf16>
    %cst_271 = arith.constant dense<0.000000e+00> : vector<8x7xf32>
    %340 = tpu.matmul %338, %339, %cst_271 {dimension_numbers = #tpu.dot_dimension_numbers<[1], [0], [0], [1], [0, 0, 1, 1], [], []>} : vector<8x32xbf16>, vector<32x7xbf16>, vector<8x7xf32> -> vector<8x7xf32>
    %341 = arith.addf %336, %340 : vector<8x7xf32>
    %c9_272 = arith.constant 9 : index
    %c0_273 = arith.constant 0 : index
    %c0_274 = arith.constant 0 : index
    %342 = vector.load %arg8[%c9_272, %c0_273, %c0_274] : memref<16x8x32xbf16, #tpu.memory_space<vmem>>, vector<1x8x32xbf16>
    %343 = vector.shape_cast %342 : vector<1x8x32xbf16> to vector<8x32xbf16>
    %c0_275 = arith.constant 0 : index
    %c11_276 = arith.constant 11 : index
    %344 = vector.load %arg16[%c0_275, %c11_276] : memref<32x25xbf16, #tpu.memory_space<vmem>>, vector<32x7xbf16>
    %cst_277 = arith.constant dense<0.000000e+00> : vector<8x7xf32>
    %345 = tpu.matmul %343, %344, %cst_277 {dimension_numbers = #tpu.dot_dimension_numbers<[1], [0], [0], [1], [0, 0, 1, 1], [], []>} : vector<8x32xbf16>, vector<32x7xbf16>, vector<8x7xf32> -> vector<8x7xf32>
    %346 = arith.addf %341, %345 : vector<8x7xf32>
    %c10_278 = arith.constant 10 : index
    %c0_279 = arith.constant 0 : index
    %c0_280 = arith.constant 0 : index
    %347 = vector.load %arg8[%c10_278, %c0_279, %c0_280] : memref<16x8x32xbf16, #tpu.memory_space<vmem>>, vector<1x8x32xbf16>
    %348 = vector.shape_cast %347 : vector<1x8x32xbf16> to vector<8x32xbf16>
    %c0_281 = arith.constant 0 : index
    %c12_282 = arith.constant 12 : index
    %349 = vector.load %arg16[%c0_281, %c12_282] : memref<32x25xbf16, #tpu.memory_space<vmem>>, vector<32x7xbf16>
    %cst_283 = arith.constant dense<0.000000e+00> : vector<8x7xf32>
    %350 = tpu.matmul %348, %349, %cst_283 {dimension_numbers = #tpu.dot_dimension_numbers<[1], [0], [0], [1], [0, 0, 1, 1], [], []>} : vector<8x32xbf16>, vector<32x7xbf16>, vector<8x7xf32> -> vector<8x7xf32>
    %351 = arith.addf %346, %350 : vector<8x7xf32>
    %c11_284 = arith.constant 11 : index
    %c0_285 = arith.constant 0 : index
    %c0_286 = arith.constant 0 : index
    %352 = vector.load %arg8[%c11_284, %c0_285, %c0_286] : memref<16x8x32xbf16, #tpu.memory_space<vmem>>, vector<1x8x32xbf16>
    %353 = vector.shape_cast %352 : vector<1x8x32xbf16> to vector<8x32xbf16>
    %c0_287 = arith.constant 0 : index
    %c13_288 = arith.constant 13 : index
    %354 = vector.load %arg16[%c0_287, %c13_288] : memref<32x25xbf16, #tpu.memory_space<vmem>>, vector<32x7xbf16>
    %cst_289 = arith.constant dense<0.000000e+00> : vector<8x7xf32>
    %355 = tpu.matmul %353, %354, %cst_289 {dimension_numbers = #tpu.dot_dimension_numbers<[1], [0], [0], [1], [0, 0, 1, 1], [], []>} : vector<8x32xbf16>, vector<32x7xbf16>, vector<8x7xf32> -> vector<8x7xf32>
    %356 = arith.addf %351, %355 : vector<8x7xf32>
    %c12_290 = arith.constant 12 : index
    %c0_291 = arith.constant 0 : index
    %c0_292 = arith.constant 0 : index
    %357 = vector.load %arg8[%c12_290, %c0_291, %c0_292] : memref<16x8x32xbf16, #tpu.memory_space<vmem>>, vector<1x8x32xbf16>
    %358 = vector.shape_cast %357 : vector<1x8x32xbf16> to vector<8x32xbf16>
    %c0_293 = arith.constant 0 : index
    %c15_294 = arith.constant 15 : index
    %359 = vector.load %arg16[%c0_293, %c15_294] : memref<32x25xbf16, #tpu.memory_space<vmem>>, vector<32x7xbf16>
    %cst_295 = arith.constant dense<0.000000e+00> : vector<8x7xf32>
    %360 = tpu.matmul %358, %359, %cst_295 {dimension_numbers = #tpu.dot_dimension_numbers<[1], [0], [0], [1], [0, 0, 1, 1], [], []>} : vector<8x32xbf16>, vector<32x7xbf16>, vector<8x7xf32> -> vector<8x7xf32>
    %361 = arith.addf %356, %360 : vector<8x7xf32>
    %c13_296 = arith.constant 13 : index
    %c0_297 = arith.constant 0 : index
    %c0_298 = arith.constant 0 : index
    %362 = vector.load %arg8[%c13_296, %c0_297, %c0_298] : memref<16x8x32xbf16, #tpu.memory_space<vmem>>, vector<1x8x32xbf16>
    %363 = vector.shape_cast %362 : vector<1x8x32xbf16> to vector<8x32xbf16>
    %c0_299 = arith.constant 0 : index
    %c16_300 = arith.constant 16 : index
    %364 = vector.load %arg16[%c0_299, %c16_300] : memref<32x25xbf16, #tpu.memory_space<vmem>>, vector<32x7xbf16>
    %cst_301 = arith.constant dense<0.000000e+00> : vector<8x7xf32>
    %365 = tpu.matmul %363, %364, %cst_301 {dimension_numbers = #tpu.dot_dimension_numbers<[1], [0], [0], [1], [0, 0, 1, 1], [], []>} : vector<8x32xbf16>, vector<32x7xbf16>, vector<8x7xf32> -> vector<8x7xf32>
    %366 = arith.addf %361, %365 : vector<8x7xf32>
    %c14_302 = arith.constant 14 : index
    %c0_303 = arith.constant 0 : index
    %c0_304 = arith.constant 0 : index
    %367 = vector.load %arg8[%c14_302, %c0_303, %c0_304] : memref<16x8x32xbf16, #tpu.memory_space<vmem>>, vector<1x8x32xbf16>
    %368 = vector.shape_cast %367 : vector<1x8x32xbf16> to vector<8x32xbf16>
    %c0_305 = arith.constant 0 : index
    %c17 = arith.constant 17 : index
    %369 = vector.load %arg16[%c0_305, %c17] : memref<32x25xbf16, #tpu.memory_space<vmem>>, vector<32x7xbf16>
    %cst_306 = arith.constant dense<0.000000e+00> : vector<8x7xf32>
    %370 = tpu.matmul %368, %369, %cst_306 {dimension_numbers = #tpu.dot_dimension_numbers<[1], [0], [0], [1], [0, 0, 1, 1], [], []>} : vector<8x32xbf16>, vector<32x7xbf16>, vector<8x7xf32> -> vector<8x7xf32>
    %371 = arith.addf %366, %370 : vector<8x7xf32>
    %c15_307 = arith.constant 15 : index
    %c0_308 = arith.constant 0 : index
    %c0_309 = arith.constant 0 : index
    %372 = vector.load %arg8[%c15_307, %c0_308, %c0_309] : memref<16x8x32xbf16, #tpu.memory_space<vmem>>, vector<1x8x32xbf16>
    %373 = vector.shape_cast %372 : vector<1x8x32xbf16> to vector<8x32xbf16>
    %c0_310 = arith.constant 0 : index
    %c18_311 = arith.constant 18 : index
    %374 = vector.load %arg16[%c0_310, %c18_311] : memref<32x25xbf16, #tpu.memory_space<vmem>>, vector<32x7xbf16>
    %cst_312 = arith.constant dense<0.000000e+00> : vector<8x7xf32>
    %375 = tpu.matmul %373, %374, %cst_312 {dimension_numbers = #tpu.dot_dimension_numbers<[1], [0], [0], [1], [0, 0, 1, 1], [], []>} : vector<8x32xbf16>, vector<32x7xbf16>, vector<8x7xf32> -> vector<8x7xf32>
    %376 = arith.addf %371, %375 : vector<8x7xf32>
    %c0_313 = arith.constant 0 : index
    %c0_314 = arith.constant 0 : index
    %377 = vector.load %arg9[%c0_313, %c0_314] : memref<8x1xf32, #tpu.memory_space<vmem>>, vector<8x1xf32>
    %378 = vector.broadcast %377 : vector<8x1xf32> to vector<8x7xf32>
    %379 = arith.addf %376, %378 : vector<8x7xf32>
    %380 = vector.extract_strided_slice %379 {offsets = [0, 0], sizes = [1, 2], strides = [1, 1]} : vector<8x7xf32> to vector<1x2xf32>
    %c0_315 = arith.constant 0 : index
    %c0_316 = arith.constant 0 : index
    %c0_317 = arith.constant 0 : index
    %381 = vector.load %arg13[%c0_315, %c0_316, %c0_317] : memref<1x1x4xf32, #tpu.memory_space<vmem>>, vector<1x1x2xf32>
    %382 = vector.shape_cast %381 : vector<1x1x2xf32> to vector<1x2xf32>
    %383 = vector.shape_cast %380 : vector<1x2xf32> to vector<1x1x2xf32>
    tpu.vector_store %arg13[%c0_315, %c0_316, %c0_317], %383 {strides = array<i32>} : memref<1x1x4xf32, #tpu.memory_space<vmem>>, vector<1x1x2xf32>,
    %384 = vector.extract_strided_slice %379 {offsets = [0, 5], sizes = [1, 2], strides = [1, 1]} : vector<8x7xf32> to vector<1x2xf32>
    %c0_318 = arith.constant 0 : index
    %c0_319 = arith.constant 0 : index
    %c2_320 = arith.constant 2 : index
    %385 = vector.load %arg13[%c0_318, %c0_319, %c2_320] : memref<1x1x4xf32, #tpu.memory_space<vmem>>, vector<1x1x2xf32>
    %386 = vector.shape_cast %385 : vector<1x1x2xf32> to vector<1x2xf32>
    %387 = vector.shape_cast %384 : vector<1x2xf32> to vector<1x1x2xf32>
    tpu.vector_store %arg13[%c0_318, %c0_319, %c2_320], %387 {strides = array<i32>} : memref<1x1x4xf32, #tpu.memory_space<vmem>>, vector<1x1x2xf32>,
    return
  }
  func.func @transform_0(%arg0: i32) -> (i32, i32, i32) {
    %c0_i32 = arith.constant 0 : i32
    %c0_i32_0 = arith.constant 0 : i32
    %c0_i32_1 = arith.constant 0 : i32
    return %arg0, %c0_i32, %c0_i32_0 : i32, i32, i32
  }
  func.func @transform_1(%arg0: i32) -> (i32, i32) {
    %c0_i32 = arith.constant 0 : i32
    %c0_i32_0 = arith.constant 0 : i32
    %c0_i32_1 = arith.constant 0 : i32
    return %c0_i32, %c0_i32_0 : i32, i32
  }
  func.func @transform_2(%arg0: i32) -> (i32, i32) {
    %c0_i32 = arith.constant 0 : i32
    %c0_i32_0 = arith.constant 0 : i32
    %c0_i32_1 = arith.constant 0 : i32
    return %c0_i32, %c0_i32_0 : i32, i32
  }
  func.func @transform_3(%arg0: i32) -> (i32, i32, i32) {
    %c0_i32 = arith.constant 0 : i32
    %c0_i32_0 = arith.constant 0 : i32
    %c0_i32_1 = arith.constant 0 : i32
    %c0_i32_2 = arith.constant 0 : i32
    return %c0_i32, %c0_i32_0, %c0_i32_1 : i32, i32, i32
  }
  func.func @transform_4(%arg0: i32) -> (i32, i32) {
    %c0_i32 = arith.constant 0 : i32
    %c0_i32_0 = arith.constant 0 : i32
    %c0_i32_1 = arith.constant 0 : i32
    return %c0_i32, %c0_i32_0 : i32, i32
  }
  func.func @transform_5(%arg0: i32) -> (i32, i32, i32) {
    %c0_i32 = arith.constant 0 : i32
    %c0_i32_0 = arith.constant 0 : i32
    %c0_i32_1 = arith.constant 0 : i32
    %c0_i32_2 = arith.constant 0 : i32
    return %c0_i32, %c0_i32_0, %c0_i32_1 : i32, i32, i32
  }
  func.func @transform_6(%arg0: i32) -> (i32, i32) {
    %c0_i32 = arith.constant 0 : i32
    %c0_i32_0 = arith.constant 0 : i32
    %c0_i32_1 = arith.constant 0 : i32
    return %c0_i32, %c0_i32_0 : i32, i32
  }
  func.func @transform_7(%arg0: i32) -> (i32, i32, i32) {
    %c0_i32 = arith.constant 0 : i32
    %c0_i32_0 = arith.constant 0 : i32
    %c0_i32_1 = arith.constant 0 : i32
    %c0_i32_2 = arith.constant 0 : i32
    return %c0_i32, %c0_i32_0, %c0_i32_1 : i32, i32, i32
  }
  func.func @transform_8(%arg0: i32) -> (i32, i32) {
    %c0_i32 = arith.constant 0 : i32
    %c0_i32_0 = arith.constant 0 : i32
    %c0_i32_1 = arith.constant 0 : i32
    return %c0_i32, %c0_i32_0 : i32, i32
  }
  func.func @transform_9(%arg0: i32) -> (i32, i32, i32) {
    %c0_i32 = arith.constant 0 : i32
    %c0_i32_0 = arith.constant 0 : i32
    %c0_i32_1 = arith.constant 0 : i32
    return %arg0, %c0_i32, %c0_i32_0 : i32, i32, i32
  }
  func.func @transform_10(%arg0: i32) -> (i32, i32, i32) {
    %c0_i32 = arith.constant 0 : i32
    %c0_i32_0 = arith.constant 0 : i32
    %c0_i32_1 = arith.constant 0 : i32
    return %arg0, %c0_i32, %c0_i32_0 : i32, i32, i32
  }
  func.func @transform_11(%arg0: i32) -> (i32, i32, i32) {
    %c0_i32 = arith.constant 0 : i32
    %c0_i32_0 = arith.constant 0 : i32
    %c0_i32_1 = arith.constant 0 : i32
    return %arg0, %c0_i32, %c0_i32_0 : i32, i32, i32
  }
  func.func @transform_12(%arg0: i32) -> (i32, i32, i32) {
    %c0_i32 = arith.constant 0 : i32
    %c0_i32_0 = arith.constant 0 : i32
    %c0_i32_1 = arith.constant 0 : i32
    return %arg0, %c0_i32, %c0_i32_0 : i32, i32, i32
  }
}

</mosaic_0001>

<bundles_post_ra>
// kernel: patch_critic_forward.1
= control target key start
LH: loop header
LB: loop body
LE: loop exit
PB: predicated region body
PF: predicated region fallthrough
CT: control target
= control target key end

     0   :  { %s4275_s21 = smov 0   ;;  %s4875_s0 = inlined_call_operand.vmem [shape: bf16[2,64,64], index: 0, kind: input, shape index: {}]   ;;  %s4876_s1 = inlined_call_operand.vmem [shape: bf16[8,64], index: 1, kind: input, shape index: {}]   ;;  %s4877_s2 = inlined_call_operand.vmem [shape: f32[8,1], index: 2, kind: input, shape index: {}]   ;;  %s4878_s3 = inlined_call_operand.vmem [shape: bf16[4,16,32], index: 3, kind: input, shape index: {}]   ;;  %s4879_s4 = inlined_call_operand.vmem [shape: f32[16,1], index: 4, kind: input, shape index: {}]   ;;  %s4880_s5 = inlined_call_operand.vmem [shape: bf16[16,32,16], index: 5, kind: input, shape index: {}]   ;;  %s4881_s6 = inlined_call_operand.vmem [shape: f32[32,1], index: 6, kind: input, shape index: {}]   ;;  %s4882_s7 = inlined_call_operand.vmem [shape: bf16[16,8,32], index: 7, kind: input, shape index: {}]   ;;  %s4883_s8 = inlined_call_operand.vmem [shape: f32[8,1], index: 8, kind: input, shape index: {}]   ;;  %s4884_s9 = inlined_call_operand.vmem [shape: f32[2,8,64], index: 9, kind: output, shape index: {0}]   ;;  %s4885_s10 = inlined_call_operand.vmem [shape: f32[2,16,16], index: 10, kind: output, shape index: {1}]   ;;  %s4886_s11 = inlined_call_operand.vmem [shape: f32[2,32,9], index: 11, kind: output, shape index: {2}]   ;;  %s4887_s12 = inlined_call_operand.vmem [shape: f32[2,1,4], index: 12, kind: output, shape index: {3}]  }
   0x1 LB: > { %s3461_s22 = sadd.s32 4294967295, %s4167_s21   ;;  %p3465_p0 = scmp.ge.s32.totalorder %s4167_s21, 1  ;;  %s4167_s21 = sphi %s4275_s21, %s23_s21  }
   0x2   : > { %p369_p1 = scmp.lt.s32.totalorder %s4167_s21, 3 }
   0x4   : > { %p370_p2 = pnand %p3465_p0, %p369_p1 }
   0x5   : > { %p423_p3 = scmp.lt.s32.totalorder (!%p370_p2), %s3461_s22, 1  ;;  %s4172_s17 = smov (!%p370_p2), 86  }
   0x6   : > { %373 = sbr.rel (%p370_p2) target bundleno = 2483 (0x9b3), region = 56  ;;  %s4173_s18 = smov (!%p370_p2), 101  }
   0x7   : > { %s4174_s19 = smov (!%p370_p2), 102   ;;  %s4175_s20 = smov (!%p370_p2), 87  }
   0x8   : > { %s4176_s23 = smov (!%p370_p2), 103   ;;  %s4177_s24 = smov (!%p370_p2), 88  }
   0x9   : > { %s4178_s26 = smov (!%p370_p2), 104   ;;  %s4179_s27 = smov (!%p370_p2), 89  }
   0xa   : > { %s4181_s29 = smov (!%p370_p2), 1   ;;  %s4182_s30 = smov (!%p370_p2), 114  }
   0xb   : > { %v4169_v0 = vmov 0.0   ;;  %vm4170_vm0 = vmmov 0   ;;  %v467_v1 = vld [vmem:[%s4877_s2] sm:$0xff]  ;;  %s4916_s22 = smov (!%p423_p3, %s3461_s22), 1  ;;  %v4171_v2 = vmov 0   ;;  %vm497_vm1 = vcmask 523264  }
   0xc   : > { %3784 = vmatprep.subr.bf16.mxu0 %v4169_v0  ;;  %3792 = vmatprep.mubr.msk.bf16.mxu0 %vm4170_vm0, %v4169_v0  ;;  %s3661_s25 = sshll.u32 %s4916_s22, 5  ;;  %v458_v7 = vld [vmem:[%s4876_s1] sm:$0xf]  ;;  %vm446_vm2 = vcmask 199680   ;;  %s3468_s13 = sshll.u32 %s4916_s22, 3  ;;  %vm546_vm4 = vcmask 27648   ;;  %v880_v46 = vlaneseq }
   0xd   : > { %4105 = vset.pattern.permute.xlu0 %v4171_v2  ;;  %3796 = vmatprep.subr.bf16.mxu1 %v4169_v0  ;;  %s427_s28 = scalar_lea.vmem %s4875_s0, %s3661_s25  ;;  %450 = vst.msk [vmem:[#allocation2 + $0xc] sm:$0xf] %vm446_vm2, %v4171_v2  ;;  %447 = vst.msk [vmem:[#allocation2] sm:$0xf] %vm446_vm2, %v4171_v2  ;;  %s431_s16 = scalar_lea.vmem %s4884_s9, %s3468_s13  ;;  %vm574_vm5 = vcmask 76848   ;;  %vm554_vm6 = vcmask 68648  }
   0xe   : > { %470 = vperm.xlu0 %4105, %v467_v1   ;;  %3800 = vmatprep.mubr.msk.bf16.mxu1 %vm4170_vm0, %v4169_v0  ;;  %v4107_v3 = vld [vmem:[%s427_s28 + $0x18] sm:$0xff]   ;;  %v4108_v4 = vld [vmem:[%s427_s28 + $0x10] sm:$0xff]   ;;  %v4109_v5 = vld [vmem:[%s427_s28 + $0x8] sm:$0xff]   ;;  %448 = vst.msk [vmem:[#allocation2 + $0x4] sm:$0xf] %vm446_vm2, %v4171_v2  ;;  %s4183_s13 = smov 2  }
   0xf   : > { %4106 = vset.pattern.permute.xlu1 %v4171_v2  ;;  %3785 = vmatpush3.bf16.msra.mxu0 %v4107_v3  ;;  %v4110_v6 = vld [vmem:[%s427_s28] sm:$0xff]   ;;  %449 = vst.msk [vmem:[#allocation2 + $0x8] sm:$0xf] %vm446_vm2, %v4171_v2  ;;  %454 = vst.msk [vmem:[#allocation4] sm:$0xf] %vm446_vm2, %v4171_v2  ;;  %s4180_s28 = smov 113  }
  0x10   : > { %3786 = vmatprep.subr.bf16.mxu0 %v4169_v0  ;;  %455 = vst.msk [vmem:[#allocation4 + $0x4] sm:$0xf] %vm446_vm2, %v4171_v2  ;;  %456 = vst.msk [vmem:[#allocation4 + $0x8] sm:$0xf] %vm446_vm2, %v4171_v2  ;;  %s4896_s14 = smov 115   ;;  %s4185_s15 = smov 3  }
  0x11   : > { %457 = vst.msk [vmem:[#allocation4 + $0xc] sm:$0xf] %vm446_vm2, %v4171_v2  ;;  %vm559_vm7 = vcmask 109648   ;;  %vm579_vm8 = vcmask 117848   ;;  %vm564_vm9 = vcmask 150648   ;;  %vm584_vm10 = vcmask 158848  }
  0x12   : > { %vm601_vm11 = vcmask 191648   ;;  %vm618_vm12 = vcmask 199848   ;;  %vm569_vm13 = vcmask 35848   ;;  %v866_v34 = vld [vmem:[%s4879_s4] sm:$0xff]  ;;  %v867_v35 = vld [vmem:[%s4879_s4 + $0x8] sm:$0xff]  ;;  %v4115_v41 = vld [vmem:[%s4878_s3 + $0x10] sm:$0xff]  }
  0x13   : > { %3787 = vmatpush3.bf16.msra.mxu0 %v4108_v4  ;;  %v4113_v40 = vld [vmem:[%s4878_s3 + $0x8] sm:$0xff]   ;;  %vm650_vm14 = vcmask 261120   ;;  %v4114_v42 = vld [vmem:[%s4878_s3] sm:$0xff]   ;;  %v4116_v45 = vld [vmem:[%s4878_s3 + $0x18] sm:$0xff]   ;;  %v4379_v47 = vand.u32 127, %v880_v46 }
  0x14   : > { %3788 = vmatprep.subr.bf16.mxu0 %v4169_v0 }
  0x15   : > { %v4382_v48 = vmul.u32.u64.low 3435973837, %v4379_v47  ;;  %v4383_v49 = vmul.u32.u64.high 3435973837, %v4379_v47, %v4382_v48 }
  0x17   : > { %3789 = vmatpush3.bf16.msra.mxu0 %v4109_v5  ;;  %v888_v50 = vshrl.u32 %v4383_v49, 2 }
  0x18   : > { %3790 = vmatprep.subr.bf16.mxu0 %v4169_v0 }
  0x19   : > { %v889_v53 = vmul.u32 5, %v888_v50 }
  0x1b   : > { %3791 = vmatpush3.bf16.msra.mxu0 %v4110_v6  ;;  %v890_v58 = vsub.s32 %v4379_v47, %v889_v53 }
  0x1c   : > { %3812 = vmatprep.subr.bf16.mxu0 %v4169_v0 }
  0x1d   : > { %vm893_vm15 = vcmp.ne.s32.totalorder %v890_v58, 0  ;;  %v896_v1 = vadd.s32 5, %v890_v58 }
  0x1e   : > { %3793 = vmatmul.mubr.msk.bf16.vlgmr.msra.gmra.mxu0 %vm497_vm1, %v458_v7 }
  0x1f   : > { %3816 = vmatprep.mubr.msk.bf16.mxu0 %vm4170_vm0, %v4169_v0 }
  0x89   : > { %v471_v8 = vpop.permute.xlu0 %470 }
  0xde   : > { %v535_v9 = vpop.f32.mrf.mxu0 }
  0xdf   : > { %v536_v10 = vadd.f32 %v535_v9, %v471_v8 }
  0xe0   : > { %v3794_v11 = vpop.f32.mrf.mxu0 }
  0xe1   : > { %vm541_vm3 = vcmp.ge.f32.partialorder %v536_v10, 0.0  ;;  %v542_v12 = vmul.f32 0.2, %v536_v10 }
  0xe2   : > { %v538_v13 = vpop.f32.mrf.mxu0 }
  0xe3   : > { %v543_v14 = vsel %vm541_vm3, %v536_v10, %v542_v12  ;;  %v4123_v12 = vld [vmem:[%s4880_s5 + $0x20] sm:$0xff]  }
  0xe4   : > { %544 = vst.msk [vmem:[%s431_s16] sm:$0xff] %vm497_vm1, %v543_v14  ;;  %v545_v15 = vpack.c.bf16 %v543_v14, %v543_v14  ;;  %v3795_v16 = vpop.f32.mrf.mxu0  ;;  %s4894_s16 = smov 116   ;;  %vm894_vm1 = vcmp.lt.s32.totalorder %v890_v58, 0 }
  0xe5   : > { %vm895_vm2 = vmand %vm894_vm1, %vm893_vm15 }
  0xe6   : > { %603 = vrot.lane.b32.xlu1 %v545_v15, %s4172_s17  ;;  %586 = vrot.lane.b32.xlu0 %v545_v15, %s4173_s18  ;;  %547 = vst.msk [vmem:[#allocation2] sm:$0xf] %vm546_vm4, %v545_v15  ;;  %s4187_s17 = smov 127   ;;  %s4888_s18 = smov 123   ;;  %v897_v7 = vsel %vm895_vm2, %v896_v1, %v890_v58  ;;  %vm901_vm4 = vcmask 154624  }
  0xe7   : > { %vm4387_vm3 = vcmp.lt.s32.totalorder %v897_v7, 4  ;;  %v2242_v7 = vld [vmem:[%s4881_s6 + $0x18] sm:$0xff] }
  0xea   : > { %590 = vrot.lane.b32.xlu1 %v545_v15, %s4174_s19  ;;  %607 = vrot.lane.b32.xlu0 %v545_v15, %s4175_s20  ;;  %s4190_s19 = smov 7   ;;  %s4191_s20 = smov 9  }
  0xee   : > { %594 = vrot.lane.b32.xlu1 %v545_v15, %s4176_s23  ;;  %611 = vrot.lane.b32.xlu0 %v545_v15, %s4177_s24  ;;  %s4892_s23 = smov 122   ;;  %s4192_s24 = smov 8  }
  0xf2   : > { %598 = vrot.lane.b32.xlu1 %v545_v15, %s4178_s26  ;;  %615 = vrot.lane.b32.xlu0 %v545_v15, %s4179_s27  ;;  %s3662_s27 = sshll.u32 %s4916_s22, 4  ;;  %s4193_s26 = smov 10  }
  0xf6   : > { %566 = vrot.lane.b32.xlu1 %v545_v15, %s4180_s28  ;;  %551 = vrot.lane.b32.xlu0 %v545_v15, %s4181_s29  ;;  %s4201_s29 = smov 109  }
  0xfa   : > { %571 = vrot.lane.b32.xlu1 %v545_v15, %s4182_s30  ;;  %556 = vrot.lane.b32.xlu0 %v545_v15, %s4183_s13  ;;  %s4195_s13 = smov 125  }
  0xfe   : > { %576 = vrot.lane.b32.xlu1 %v545_v15, %s4896_s14  ;;  %561 = vrot.lane.b32.xlu0 %v545_v15, %s4185_s15  ;;  %s4409_s15 = scalar_lea.vmem %s4885_s10, %s3662_s27  ;;  %s4200_s27 = smov 108  }
 0x102   : > { %581 = vrot.lane.b32.xlu1 %v545_v15, %s4894_s16 }
 0x158   : > { %v604_v17 = vpop.permute.xlu1 %603  ;;  %v587_v18 = vpop.permute.xlu0 %586 }
 0x159   : > { %606 = vst.msk [vmem:[#allocation2 + $0xc] sm:$0xf] %vm574_vm5, %v604_v17 }
 0x15a   : > { %589 = vst.msk [vmem:[#allocation2 + $0x8] sm:$0xf] %vm554_vm6, %v587_v18 }
 0x15c   : > { %v591_v19 = vpop.permute.xlu1 %590  ;;  %v608_v20 = vpop.permute.xlu0 %607 }
 0x15d   : > { %593 = vst.msk [vmem:[#allocation2 + $0x8] sm:$0xf] %vm559_vm7, %v591_v19 }
 0x15e   : > { %610 = vst.msk [vmem:[#allocation2 + $0xc] sm:$0xf] %vm579_vm8, %v608_v20 }
 0x160   : > { %v595_v21 = vpop.permute.xlu1 %594  ;;  %v612_v22 = vpop.permute.xlu0 %611 }
 0x161   : > { %597 = vst.msk [vmem:[#allocation2 + $0x8] sm:$0xf] %vm564_vm9, %v595_v21 }
 0x162   : > { %614 = vst.msk [vmem:[#allocation2 + $0xc] sm:$0xf] %vm584_vm10, %v612_v22 }
 0x164   : > { %v599_v23 = vpop.permute.xlu1 %598  ;;  %v616_v24 = vpop.permute.xlu0 %615 }
 0x165   : > { %602 = vst.msk [vmem:[#allocation2 + $0x8] sm:$0xf] %vm601_vm11, %v599_v23  ;;  %vm971_vm11 = vcmask 134248  }
 0x166   : > { %619 = vst.msk [vmem:[#allocation2 + $0xc] sm:$0xf] %vm618_vm12, %v616_v24  ;;  %vm989_vm12 = vcmask 183448  }
 0x168   : > { %v567_v25 = vpop.permute.xlu1 %566  ;;  %v552_v26 = vpop.permute.xlu0 %551 }
 0x169   : > { %570 = vst.msk [vmem:[#allocation2 + $0x4] sm:$0xf] %vm569_vm13, %v567_v25  ;;  %vm1007_vm13 = vcmask 232648  }
 0x16a   : > { %555 = vst.msk [vmem:[#allocation2] sm:$0xf] %vm554_vm6, %v552_v26 }
 0x16c   : > { %v572_v27 = vpop.permute.xlu1 %571  ;;  %v557_v28 = vpop.permute.xlu0 %556 }
 0x16d   : > { %v4111_v29 = vld [vmem:[#allocation2 + $0x8] sm:$0xff]   ;;  %575 = vst.msk [vmem:[#allocation2 + $0x4] sm:$0xf] %vm574_vm5, %v572_v27  ;;  %vm451_vm5 = vcmask 289792  }
 0x16e   : > { %560 = vst.msk [vmem:[#allocation2] sm:$0xf] %vm559_vm7, %v557_v28  ;;  %646 = vrot.lane.b32.xlu0 %v4111_v29, %s4187_s17  ;;  %vm936_vm7 = vcmask 31744  }
 0x16f   : > { %452 = vst.msk [vmem:[#allocation3] sm:$0xf] %vm451_vm5, %v4171_v2  ;;  %453 = vst.msk [vmem:[#allocation3 + $0x4] sm:$0xf] %vm451_vm5, %v4171_v2 }
 0x170   : > { %v577_v30 = vpop.permute.xlu1 %576  ;;  %v562_v31 = vpop.permute.xlu0 %561 }
 0x171   : > { %580 = vst.msk [vmem:[#allocation2 + $0x4] sm:$0xf] %vm579_vm8, %v577_v30 }
 0x172   : > { %565 = vst.msk [vmem:[#allocation2] sm:$0xf] %vm564_vm9, %v562_v31  ;;  %756 = vrot.lane.b32.xlu0 %v4111_v29, %s4888_s18  ;;  %vm1039_vm9 = vcmask 130048  }
 0x174   : > { %v582_v32 = vpop.permute.xlu1 %581 }
 0x175   : > { %585 = vst.msk [vmem:[#allocation2 + $0x4] sm:$0xf] %vm584_vm10, %v582_v32  ;;  %vm951_vm10 = vcmask 85048  }
 0x17c   : > { %v4112_v33 = vld [vmem:[#allocation2] sm:$0xff]  }
 0x17d   : > { %754 = vrot.lane.b32.xlu0 %v4112_v33, %s4888_s18  ;;  %644 = vrot.lane.b32.xlu1 %v4112_v33, %s4187_s17  ;;  %s4898_s18 = smov 121  }
 0x181   : > { %870 = vperm.xlu0 %4105, %v866_v34   ;;  %816 = vrot.lane.b32.xlu1 %v4111_v29, %s4892_s23 }
 0x185   : > { %814 = vrot.lane.b32.xlu1 %v4112_v33, %s4892_s23 }
 0x189   : > { %875 = vperm.xlu1 %4106, %v867_v35  }
 0x1e0   : > { %v647_v36 = vpop.permute.xlu0 %646 }
 0x1e1   : > { %3797 = vmatpush3.bf16.msra.mxu1 %v647_v36 }
 0x1e2   : > { %3798 = vmatprep.subr.bf16.mxu1 %v4169_v0 }
 0x1e4   : > { %v757_v37 = vpop.permute.xlu0 %756 }
 0x1e5   : > { %3813 = vmatpush3.bf16.msra.mxu0 %v757_v37 }
 0x1e6   : > { %3814 = vmatprep.subr.bf16.mxu0 %v4169_v0 }
 0x1ef   : > { %v755_v38 = vpop.permute.xlu0 %754  ;;  %v645_v39 = vpop.permute.xlu1 %644 }
 0x1f0   : > { %3799 = vmatpush3.bf16.msra.mxu1 %v645_v39  ;;  %3815 = vmatpush3.bf16.msra.mxu0 %v755_v38 }
 0x1f1   : > { %3804 = vmatprep.subr.bf16.mxu1 %v4169_v0 }
 0x1f3   : > { %3801 = vmatmul.mubr.msk.bf16.vlgmr.msra.gmra.mxu1 %vm650_vm14, %v4113_v40  ;;  %3817 = vmatmul.mubr.msk.bf16.vlgmr.msra.gmra.mxu0 %vm650_vm14, %v4115_v41  ;;  %v817_v43 = vpop.permute.xlu1 %816 }
 0x1f4   : > { %3805 = vmatpush3.bf16.msra.mxu1 %v4111_v29  ;;  %3808 = vmatprep.mubr.msk.bf16.mxu1 %vm4170_vm0, %v4169_v0 }
 0x1f5   : > { %3806 = vmatprep.subr.bf16.mxu1 %v4169_v0 }
 0x1f7   : > { %v815_v44 = vpop.permute.xlu1 %814 }
 0x1f8   : > { %3807 = vmatpush3.bf16.msra.mxu1 %v4112_v33 }
 0x1f9   : > { %3820 = vmatprep.subr.bf16.mxu1 %v4169_v0 }
 0x1fb   : > { %3809 = vmatmul.mubr.msk.bf16.vlgmr.msra.gmra.mxu1 %vm650_vm14, %v4114_v42 }
 0x1fc   : > { %3821 = vmatpush3.bf16.msra.mxu1 %v817_v43  ;;  %3824 = vmatprep.mubr.msk.bf16.mxu1 %vm4170_vm0, %v4169_v0  ;;  %v871_v10 = vpop.permute.xlu0 %870 }
 0x1fd   : > { %3822 = vmatprep.subr.bf16.mxu1 %v4169_v0 }
 0x200   : > { %3823 = vmatpush3.bf16.msra.mxu1 %v815_v44 }
 0x203   : > { %3825 = vmatmul.mubr.msk.bf16.vlgmr.msra.gmra.mxu1 %vm650_vm14, %v4116_v45 }
 0x204   : > { %v876_v16 = vpop.permute.xlu1 %875 }
 0x2b3   : > { %v688_v51 = vpop.f32.mrf.mxu1  ;;  %v797_v52 = vpop.f32.mrf.mxu0 }
 0x2b5   : > { %v3802_v54 = vpop.f32.mrf.mxu1  ;;  %v3818_v55 = vpop.f32.mrf.mxu0 }
 0x2b7   : > { %v691_v56 = vpop.f32.mrf.mxu1  ;;  %v800_v57 = vpop.f32.mrf.mxu0 }
 0x2b9   : > { %v3803_v59 = vpop.f32.mrf.mxu1  ;;  %v3819_v60 = vpop.f32.mrf.mxu0 }
 0x2bb   : > { %v739_v61 = vpop.f32.mrf.mxu1 }
 0x2bc   : > { %v740_v63 = vadd.f32 %v739_v61, %v688_v51  ;;  %v4119_v61 = vld [vmem:[%s4880_s5 + $0x10] sm:$0xff]  }
 0x2bd   : > { %v3810_v62 = vpop.f32.mrf.mxu1  ;;  %3830 = vmatprep.mubr.msk.bf16.mxu0 %vm1039_vm9, %v4119_v61 }
 0x2be   : > { %v804_v5 = vadd.f32 %v797_v52, %v740_v63  ;;  %v4117_v52 = vld [vmem:[%s4880_s5] sm:$0xff]  }
 0x2bf   : > { %v742_v3 = vpop.f32.mrf.mxu1  ;;  %3836 = vmatprep.mubr.msk.bf16.mxu1 %vm1039_vm9, %v4117_v52  ;;  %v4148_v52 = vld [vmem:[%s4880_s5 + $0xf8] sm:$0xff]  }
 0x2c0   : > { %v743_v6 = vadd.f32 %v742_v3, %v691_v56  ;;  %v4118_v3 = vld [vmem:[%s4880_s5 + $0x8] sm:$0xff]  }
 0x2c1   : > { %v3811_v4 = vpop.f32.mrf.mxu1 }
 0x2c2   : > { %v805_v13 = vadd.f32 %v800_v57, %v743_v6  ;;  %v4121_v4 = vld [vmem:[%s4880_s5 + $0x30] sm:$0xff]   ;;  %v2239_v6 = vld [vmem:[%s4881_s6] sm:$0xff] }
 0x2c3   : > { %v857_v8 = vpop.f32.mrf.mxu1 }
 0x2c4   : > { %v864_v9 = vadd.f32 %v857_v8, %v804_v5  ;;  %v2241_v5 = vld [vmem:[%s4881_s6 + $0x10] sm:$0xff]  ;;  %v2240_v8 = vld [vmem:[%s4881_s6 + $0x8] sm:$0xff] }
 0x2c5   : > { %v3826_v11 = vpop.f32.mrf.mxu1 }
 0x2c6   : > { %v878_v14 = vadd.f32 %v871_v10, %v864_v9  ;;  %v4120_v11 = vld [vmem:[%s4880_s5 + $0x18] sm:$0xff]  }
 0x2c7   : > { %v860_v15 = vpop.f32.mrf.mxu1 }
 0x2c8   : > { %v865_v17 = vadd.f32 %v860_v15, %v805_v13  ;;  %v899_v18 = vsel %vm4387_vm3, %v878_v14, 0.0 }
 0x2c9   : > { %v3827_v19 = vpop.f32.mrf.mxu1  ;;  %v902_v20 = vsel %vm901_vm4, %v899_v18, 0.0  ;;  %v4124_v18 = vld [vmem:[%s4880_s5 + $0x28] sm:$0xff]  }
 0x2ca   : > { %v879_v21 = vadd.f32 %v876_v16, %v865_v17  ;;  %903 = vadd.xlane.f32.xlu0 %v902_v20  ;;  %v4125_v16 = vld [vmem:[%s4880_s5 + $0x50] sm:$0xff]   ;;  %v4127_v19 = vld [vmem:[%s4880_s5 + $0x40] sm:$0xff]  }
 0x2cc   : > { %v900_v22 = vsel %vm4387_vm3, %v879_v21, 0.0 }
 0x2cd   : > { %v905_v23 = vsel %vm901_vm4, %v900_v22, 0.0 }
 0x2ce   : > { %906 = vadd.xlane.f32.xlu1 %v905_v23  ;;  %v4129_v23 = vld [vmem:[%s4880_s5 + $0x70] sm:$0xff]  }
 0x353   : > { %v904_v24 = vpop.xlane.xlu0 %903 }
 0x354   : > { %v908_v25 = vmul.f32 0.0625, %v904_v24 }
 0x356   : > { %v910_v26 = vsub.f32 %v878_v14, %v908_v25  ;;  %v4122_v14 = vld [vmem:[%s4880_s5 + $0x38] sm:$0xff]   ;;  %v4128_v25 = vld [vmem:[%s4880_s5 + $0x48] sm:$0xff]  }
 0x357   : > { %v907_v27 = vpop.xlane.xlu1 %906 }
 0x358   : > { %v909_v28 = vmul.f32 0.0625, %v907_v27  ;;  %v912_v29 = vsel %vm4387_vm3, %v910_v26, 0.0  ;;  %v4130_v27 = vld [vmem:[%s4880_s5 + $0x78] sm:$0xff]  }
 0x359   : > { %v914_v30 = vmul.f32 %v912_v29, %v912_v29  ;;  %v4133_v29 = vld [vmem:[%s4880_s5 + $0x90] sm:$0xff]  }
 0x35a   : > { %v911_v31 = vsub.f32 %v879_v21, %v909_v28  ;;  %v4126_v21 = vld [vmem:[%s4880_s5 + $0x58] sm:$0xff]  }
 0x35b   : > { %v916_v32 = vsel %vm901_vm4, %v914_v30, 0.0  ;;  %v4132_v30 = vld [vmem:[%s4880_s5 + $0x68] sm:$0xff]  }
 0x35c   : > { %917 = vadd.xlane.f32.xlu0 %v916_v32  ;;  %v913_v33 = vsel %vm4387_vm3, %v911_v31, 0.0  ;;  %v4135_v32 = vld [vmem:[%s4880_s5 + $0x80] sm:$0xff]  }
 0x35d   : > { %v915_v34 = vmul.f32 %v913_v33, %v913_v33  ;;  %v4134_v33 = vld [vmem:[%s4880_s5 + $0x98] sm:$0xff]  }
 0x35f   : > { %v919_v35 = vsel %vm901_vm4, %v915_v34, 0.0  ;;  %vm2288_vm4 = vcmask 121856  }
 0x360   : > { %920 = vadd.xlane.f32.xlu0 %v919_v35  ;;  %v4137_v35 = vld [vmem:[%s4880_s5 + $0xb0] sm:$0xff]  }
 0x3e5   : > { %v918_v36 = vpop.xlane.xlu0 %917 }
 0x3e6   : > { %v922_v37 = vmul.f32 0.0625, %v918_v36  ;;  %v4136_v36 = vld [vmem:[%s4880_s5 + $0x88] sm:$0xff]  }
 0x3e8   : > { %v924_v38 = vadd.f32 1e-05, %v922_v37 }
 0x3e9   : > { %v921_v39 = vpop.xlane.xlu0 %920 }
 0x3ea   : > { %4149 = vrsqrt.f32 %v924_v38  ;;  %v923_v40 = vmul.f32 0.0625, %v921_v39  ;;  %v4139_v38 = vld [vmem:[%s4880_s5 + $0xa0] sm:$0xff]   ;;  %v4138_v39 = vld [vmem:[%s4880_s5 + $0xb8] sm:$0xff]  }
 0x3ec   : > { %v925_v41 = vadd.f32 1e-05, %v923_v40 }
 0x3ee   : > { %4151 = vrsqrt.f32 %v925_v41  ;;  %v4141_v41 = vld [vmem:[%s4880_s5 + $0xd0] sm:$0xff]  }
 0x3f7   : > { %v4150_v42 = vpop.eup %4149 }
 0x3f8   : > { %v928_v43 = vmul.f32 %v4150_v42, %v910_v26  ;;  %v4131_v26 = vld [vmem:[%s4880_s5 + $0x60] sm:$0xff]   ;;  %v4140_v42 = vld [vmem:[%s4880_s5 + $0xa8] sm:$0xff]  }
 0x3fa   : > { %vm930_vm6 = vcmp.ge.f32.partialorder %v928_v43, 0.0  ;;  %v932_v44 = vmul.f32 0.2, %v928_v43 }
 0x3fb   : > { %v4152_v45 = vpop.eup %4151 }
 0x3fc   : > { %v929_v46 = vmul.f32 %v4152_v45, %v911_v31  ;;  %v4411_v48 = vsel %vm930_vm6, %v928_v43, %v932_v44  ;;  %v4143_v44 = vld [vmem:[%s4880_s5 + $0xc0] sm:$0xff]   ;;  %v4142_v45 = vld [vmem:[%s4880_s5 + $0xd8] sm:$0xff]   ;;  %vm2357_vm6 = vcmask 23552  }
 0x3fd   : > { %v3665_v2 = vpack.c.bf16 %v4411_v48, %v4411_v48  ;;  %937 = vst.msk [vmem:[%s4409_s15] sm:$0xff] %vm936_vm7, %v4411_v48 }
 0x3fe   : > { %vm931_vm8 = vcmp.ge.f32.partialorder %v929_v46, 0.0  ;;  %v933_v49 = vmul.f32 0.2, %v929_v46 }
 0x3ff   : > { %945 = vrot.lane.b32.xlu1 %v3665_v2, %s4190_s19  ;;  %983 = vrot.lane.b32.xlu0 %v3665_v2, %s4191_s20 }
 0x400   : > { %v4417_v50 = vsel %vm931_vm8, %v929_v46, %v933_v49  ;;  %v4144_v49 = vld [vmem:[%s4880_s5 + $0xc8] sm:$0xff]  }
 0x401   : > { %v3666_v51 = vpack.c.bf16 %v4417_v50, %v4417_v50  ;;  %938 = vst.msk [vmem:[%s4409_s15 + $0x8] sm:$0xff] %vm936_vm7, %v4417_v50 }
 0x403   : > { %965 = vrot.lane.b32.xlu1 %v3665_v2, %s4192_s24  ;;  %947 = vrot.lane.b32.xlu0 %v3666_v51, %s4190_s19  ;;  %s4890_s19 = smov 120  }
 0x407   : > { %967 = vrot.lane.b32.xlu1 %v3666_v51, %s4192_s24  ;;  %1001 = vrot.lane.b32.xlu0 %v3665_v2, %s4193_s26  ;;  %s4198_s24 = smov 119   ;;  %v4146_v2 = vld [vmem:[%s4880_s5 + $0xf0] sm:$0xff]  }
 0x40b   : > { %985 = vrot.lane.b32.xlu1 %v3666_v51, %s4191_s20  ;;  %s4194_s20 = smov 126  }
 0x40f   : > { %1003 = vrot.lane.b32.xlu1 %v3666_v51, %s4193_s26  ;;  %s4900_s26 = smov 110   ;;  %v4145_v51 = vld [vmem:[%s4880_s5 + $0xe0] sm:$0xff]  }
 0x471   : > { %v984_v53 = vpop.permute.xlu0 %983  ;;  %v946_v54 = vpop.permute.xlu1 %945 }
 0x472   : > { %952 = vst.msk [vmem:[#allocation3] sm:$0xf] %vm951_vm10, %v946_v54 }
 0x475   : > { %v948_v55 = vpop.permute.xlu0 %947  ;;  %v966_v56 = vpop.permute.xlu1 %965 }
 0x476   : > { %953 = vst.msk [vmem:[#allocation3 + $0x4] sm:$0xf] %vm951_vm10, %v948_v55  ;;  %vm2386_vm10 = vcmask 68656  }
 0x477   : > { %972 = vst.msk [vmem:[#allocation3] sm:$0xf] %vm971_vm11, %v966_v56 }
 0x478   : > { %990 = vst.msk [vmem:[#allocation3] sm:$0xf] %vm989_vm12, %v984_v53  ;;  %v4147_v53 = vld [vmem:[%s4880_s5 + $0xe8] sm:$0xff]  }
 0x479   : > { %v1002_v57 = vpop.permute.xlu0 %1001  ;;  %v968_v58 = vpop.permute.xlu1 %967 }
 0x47a   : > { %1008 = vst.msk [vmem:[#allocation3] sm:$0xf] %vm1007_vm13, %v1002_v57 }
 0x47b   : > { %973 = vst.msk [vmem:[#allocation3 + $0x4] sm:$0xf] %vm971_vm11, %v968_v58  ;;  %vm2424_vm11 = vcmask 109656  }
 0x47d   : > { %v986_v59 = vpop.permute.xlu1 %985 }
 0x47e   : > { %991 = vst.msk [vmem:[#allocation3 + $0x4] sm:$0xf] %vm989_vm12, %v986_v59  ;;  %vm2458_vm12 = vcmask 150656  }
 0x481   : > { %v1004_v60 = vpop.permute.xlu1 %1003  ;;  %v1014_v62 = vld [vmem:[#allocation3] sm:$0xf] }
 0x482   : > { %1009 = vst.msk [vmem:[#allocation3 + $0x4] sm:$0xf] %vm1007_vm13, %v1004_v60  ;;  %vm962_vm13 = vcmask 64544  }
 0x489   : > { %v1015_v63 = vld [vmem:[#allocation3 + $0x4] sm:$0xf] }
 0x48a   : > { %v3503_v1 = vcombine.low %v1014_v62, %v1015_v63 }
 0x48c   : > { %1176 = vrot.lane.b32.xlu1 %v3503_v1, %s4194_s20  ;;  %1036 = vrot.lane.b32.xlu0 %v3503_v1, %s4187_s17 }
 0x48d   : > { %3834 = vmatprep.subr.bf16.mxu1 %v3503_v1 }
 0x48e   : > { %3835 = vmatpush3.bf16.msra.mxu1 %v3503_v1 }
 0x490   : > { %1330 = vrot.lane.b32.xlu1 %v3503_v1, %s4892_s23  ;;  %1253 = vrot.lane.b32.xlu0 %v3503_v1, %s4195_s13  ;;  %s4205_s23 = smov 4  }
 0x491   : > { %3837 = vmatmul.mubr.msk.bf16.vlgmr.msra.gmra.mxu1 %vm1039_vm9, %v4118_v3 }
 0x492   : > { %3848 = vmatprep.mubr.msk.bf16.mxu1 %vm1039_vm9, %v4121_v4 }
 0x494   : > { %1484 = vrot.lane.b32.xlu1 %v3503_v1, %s4890_s19  ;;  %1407 = vrot.lane.b32.xlu0 %v3503_v1, %s4898_s18  ;;  %s4910_s18 = smov 121   ;;  %s4209_s19 = smov 111  }
 0x498   : > { %1638 = vrot.lane.b32.xlu1 %v3503_v1, %s4894_s16  ;;  %1561 = vrot.lane.b32.xlu0 %v3503_v1, %s4198_s24  ;;  %s4202_s16 = smov 107   ;;  %s4206_s24 = smov 118  }
 0x49c   : > { %1792 = vrot.lane.b32.xlu1 %v3503_v1, %s4182_s30  ;;  %1715 = vrot.lane.b32.xlu0 %v3503_v1, %s4896_s14  ;;  %s4625_s30 = scalar_lea.vmem %s4886_s11, %s3661_s25  ;;  %s4203_s25 = smov 6  }
 0x49d   : > { %s4909_s14 = smov 122  }
 0x4a0   : > { %1946 = vrot.lane.b32.xlu1 %v3503_v1, %s4900_s26  ;;  %1869 = vrot.lane.b32.xlu0 %v3503_v1, %s4180_s28  ;;  %s4911_s26 = smov 120  }
 0x4a4   : > { %2100 = vrot.lane.b32.xlu1 %v3503_v1, %s4200_s27  ;;  %2023 = vrot.lane.b32.xlu0 %v3503_v1, %s4201_s29  ;;  %s4204_s27 = smov 5   ;;  %s4908_s29 = smov 123  }
 0x4a8   : > { %2255 = vperm.xlu1 %4106, %v2241_v5   ;;  %2177 = vrot.lane.b32.xlu0 %v3503_v1, %s4202_s16  ;;  %s4208_s16 = smov 112  }
 0x4ac   : > { %2245 = vperm.xlu1 %4106, %v2239_v6   ;;  %2260 = vperm.xlu0 %4105, %v2242_v7  }
 0x4b0   : > { %2250 = vperm.xlu0 %4105, %v2240_v8  }
 0x4fe   : > { %v1177_v9 = vpop.permute.xlu1 %1176  ;;  %v1037_v10 = vpop.permute.xlu0 %1036 }
 0x4ff   : > { %3828 = vmatprep.subr.bf16.mxu0 %v1037_v10 }
 0x500   : > { %3829 = vmatpush3.bf16.msra.mxu0 %v1037_v10 }
 0x501   : > { %3840 = vmatprep.subr.bf16.mxu0 %v1177_v9 }
 0x502   : > { %v1254_v13 = vpop.permute.xlu0 %1253  ;;  %v1331_v15 = vpop.permute.xlu1 %1330 }
 0x503   : > { %3831 = vmatmul.mubr.msk.bf16.vlgmr.msra.gmra.mxu0 %vm1039_vm9, %v4120_v11  ;;  %3846 = vmatprep.subr.bf16.mxu1 %v1254_v13 }
 0x504   : > { %3841 = vmatpush3.bf16.msra.mxu0 %v1177_v9  ;;  %3847 = vmatpush3.bf16.msra.mxu1 %v1254_v13 }
 0x505   : > { %3852 = vmatprep.subr.bf16.mxu0 %v1331_v15  ;;  %3842 = vmatprep.mubr.msk.bf16.mxu0 %vm1039_vm9, %v4123_v12 }
 0x506   : > { %v1408_v17 = vpop.permute.xlu0 %1407  ;;  %v1485_v22 = vpop.permute.xlu1 %1484 }
 0x507   : > { %3849 = vmatmul.mubr.msk.bf16.vlgmr.msra.gmra.mxu1 %vm1039_vm9, %v4122_v14  ;;  %3858 = vmatprep.subr.bf16.mxu1 %v1408_v17 }
 0x508   : > { %3859 = vmatpush3.bf16.msra.mxu1 %v1408_v17  ;;  %3860 = vmatprep.mubr.msk.bf16.mxu1 %vm1039_vm9, %v4125_v16 }
 0x50a   : > { %v1562_v20 = vpop.permute.xlu0 %1561  ;;  %v1639_v28 = vpop.permute.xlu1 %1638 }
 0x50b   : > { %3843 = vmatmul.mubr.msk.bf16.vlgmr.msra.gmra.mxu0 %vm1039_vm9, %v4124_v18  ;;  %3870 = vmatprep.subr.bf16.mxu1 %v1562_v20 }
 0x50c   : > { %3853 = vmatpush3.bf16.msra.mxu0 %v1331_v15  ;;  %3854 = vmatprep.mubr.msk.bf16.mxu0 %vm1039_vm9, %v4127_v19 }
 0x50d   : > { %3864 = vmatprep.subr.bf16.mxu0 %v1485_v22 }
 0x50e   : > { %v1716_v24 = vpop.permute.xlu0 %1715  ;;  %v1793_v34 = vpop.permute.xlu1 %1792 }
 0x50f   : > { %3861 = vmatmul.mubr.msk.bf16.vlgmr.msra.gmra.mxu1 %vm1039_vm9, %v4126_v21 }
 0x510   : > { %3871 = vmatpush3.bf16.msra.mxu1 %v1562_v20  ;;  %3872 = vmatprep.mubr.msk.bf16.mxu1 %vm1039_vm9, %v4129_v23 }
 0x511   : > { %3882 = vmatprep.subr.bf16.mxu1 %v1716_v24 }
 0x512   : > { %v1870_v31 = vpop.permute.xlu0 %1869  ;;  %v1947_v40 = vpop.permute.xlu1 %1946 }
 0x513   : > { %3855 = vmatmul.mubr.msk.bf16.vlgmr.msra.gmra.mxu0 %vm1039_vm9, %v4128_v25 }
 0x514   : > { %3865 = vmatpush3.bf16.msra.mxu0 %v1485_v22  ;;  %3866 = vmatprep.mubr.msk.bf16.mxu0 %vm1039_vm9, %v4131_v26 }
 0x515   : > { %3876 = vmatprep.subr.bf16.mxu0 %v1639_v28 }
 0x516   : > { %v2024_v37 = vpop.permute.xlu0 %2023  ;;  %v2101_v46 = vpop.permute.xlu1 %2100 }
 0x517   : > { %3873 = vmatmul.mubr.msk.bf16.vlgmr.msra.gmra.mxu1 %vm1039_vm9, %v4130_v27 }
 0x518   : > { %3883 = vmatpush3.bf16.msra.mxu1 %v1716_v24  ;;  %3884 = vmatprep.mubr.msk.bf16.mxu1 %vm1039_vm9, %v4133_v29 }
 0x519   : > { %3894 = vmatprep.subr.bf16.mxu1 %v1870_v31 }
 0x51a   : > { %v2178_v43 = vpop.permute.xlu0 %2177 }
 0x51b   : > { %3867 = vmatmul.mubr.msk.bf16.vlgmr.msra.gmra.mxu0 %vm1039_vm9, %v4132_v30 }
 0x51c   : > { %3877 = vmatpush3.bf16.msra.mxu0 %v1639_v28  ;;  %3878 = vmatprep.mubr.msk.bf16.mxu0 %vm1039_vm9, %v4135_v32 }
 0x51d   : > { %3888 = vmatprep.subr.bf16.mxu0 %v1793_v34 }
 0x51f   : > { %3885 = vmatmul.mubr.msk.bf16.vlgmr.msra.gmra.mxu1 %vm1039_vm9, %v4134_v33 }
 0x520   : > { %3895 = vmatpush3.bf16.msra.mxu1 %v1870_v31  ;;  %3896 = vmatprep.mubr.msk.bf16.mxu1 %vm1039_vm9, %v4137_v35 }
 0x521   : > { %3906 = vmatprep.subr.bf16.mxu1 %v2024_v37 }
 0x523   : > { %3879 = vmatmul.mubr.msk.bf16.vlgmr.msra.gmra.mxu0 %vm1039_vm9, %v4136_v36 }
 0x524   : > { %3889 = vmatpush3.bf16.msra.mxu0 %v1793_v34  ;;  %3890 = vmatprep.mubr.msk.bf16.mxu0 %vm1039_vm9, %v4139_v38 }
 0x525   : > { %3900 = vmatprep.subr.bf16.mxu0 %v1947_v40 }
 0x527   : > { %3897 = vmatmul.mubr.msk.bf16.vlgmr.msra.gmra.mxu1 %vm1039_vm9, %v4138_v39 }
 0x528   : > { %3907 = vmatpush3.bf16.msra.mxu1 %v2024_v37  ;;  %3908 = vmatprep.mubr.msk.bf16.mxu1 %vm1039_vm9, %v4141_v41 }
 0x529   : > { %3918 = vmatprep.subr.bf16.mxu1 %v2178_v43 }
 0x52b   : > { %3891 = vmatmul.mubr.msk.bf16.vlgmr.msra.gmra.mxu0 %vm1039_vm9, %v4140_v42 }
 0x52c   : > { %3901 = vmatpush3.bf16.msra.mxu0 %v1947_v40  ;;  %3902 = vmatprep.mubr.msk.bf16.mxu0 %vm1039_vm9, %v4143_v44  ;;  %v4581_v39 = vmul.u32.u64.low 2863311531, %v4379_v47  ;;  %v4582_v40 = vmul.u32.u64.high 2863311531, %v4379_v47, %v4581_v39 }
 0x52d   : > { %3912 = vmatprep.subr.bf16.mxu0 %v2101_v46 }
 0x52f   : > { %3909 = vmatmul.mubr.msk.bf16.vlgmr.msra.gmra.mxu1 %vm1039_vm9, %v4142_v45 }
 0x530   : > { %3919 = vmatpush3.bf16.msra.mxu1 %v2178_v43  ;;  %3920 = vmatprep.mubr.msk.bf16.mxu1 %vm1039_vm9, %v4146_v2 }
 0x531   : > { %3932 = vmatprep.subr.bf16.mxu1 %v4169_v0 }
 0x533   : > { %3903 = vmatmul.mubr.msk.bf16.vlgmr.msra.gmra.mxu0 %vm1039_vm9, %v4144_v49 }
 0x534   : > { %3913 = vmatpush3.bf16.msra.mxu0 %v2101_v46  ;;  %3914 = vmatprep.mubr.msk.bf16.mxu0 %vm1039_vm9, %v4145_v51 }
 0x535   : > { %3924 = vmatprep.subr.bf16.mxu0 %v4169_v0 }
 0x537   : > { %3921 = vmatmul.mubr.msk.bf16.vlgmr.msra.gmra.mxu1 %vm1039_vm9, %v4148_v52 }
 0x538   : > { %3936 = vmatprep.mubr.msk.bf16.mxu1 %vm4170_vm0, %v4169_v0 }
 0x53b   : > { %3915 = vmatmul.mubr.msk.bf16.vlgmr.msra.gmra.mxu0 %vm1039_vm9, %v4147_v53 }
 0x53c   : > { %3928 = vmatprep.mubr.msk.bf16.mxu0 %vm4170_vm0, %v4169_v0 }
 0x551   : > { %v3838_v54 = vpop.f32.mrf.mxu1 }
 0x553   : > { %v1146_v55 = vpop.f32.mrf.mxu1 }
 0x555   : > { %v3839_v56 = vpop.f32.mrf.mxu1 }
 0x557   : > { %v1149_v58 = vpop.f32.mrf.mxu1 }
 0x5c3   : > { %v3832_v57 = vpop.f32.mrf.mxu0 }
 0x5c4   : > { %v1155_v14 = vadd.f32 %v3838_v54, %v3832_v57 }
 0x5c5   : > { %v1080_v59 = vpop.f32.mrf.mxu0 }
 0x5c6   : > { %v1147_v17 = vadd.f32 %v1146_v55, %v1080_v59 }
 0x5c7   : > { %v3833_v60 = vpop.f32.mrf.mxu0  ;;  %v3850_v61 = vpop.f32.mrf.mxu1 }
 0x5c8   : > { %v1158_v21 = vadd.f32 %v3839_v56, %v3833_v60 }
 0x5c9   : > { %v1083_v62 = vpop.f32.mrf.mxu0  ;;  %v1296_v63 = vpop.f32.mrf.mxu1 }
 0x5ca   : > { %v1150_v25 = vadd.f32 %v1149_v58, %v1083_v62  ;;  %v2273_v62 = vshrl.u32 %v4582_v40, 2 }
 0x5cb   : > { %v3844_v1 = vpop.f32.mrf.mxu0  ;;  %v3851_v3 = vpop.f32.mrf.mxu1 }
 0x5cc   : > { %v1236_v18 = vadd.f32 %v3844_v1, %v1155_v14 }
 0x5cd   : > { %v1219_v4 = vpop.f32.mrf.mxu0  ;;  %v1299_v5 = vpop.f32.mrf.mxu1 }
 0x5ce   : > { %v1234_v22 = vadd.f32 %v1219_v4, %v1147_v17  ;;  %v1313_v26 = vadd.f32 %v3850_v61, %v1236_v18 }
 0x5cf   : > { %v3845_v6 = vpop.f32.mrf.mxu0  ;;  %v3862_v7 = vpop.f32.mrf.mxu1 }
 0x5d0   : > { %v1237_v27 = vadd.f32 %v3845_v6, %v1158_v21  ;;  %v1311_v30 = vadd.f32 %v1296_v63, %v1234_v22 }
 0x5d1   : > { %v1222_v8 = vpop.f32.mrf.mxu0  ;;  %v1450_v9 = vpop.f32.mrf.mxu1 }
 0x5d2   : > { %v1235_v31 = vadd.f32 %v1222_v8, %v1150_v25  ;;  %v1314_v35 = vadd.f32 %v3851_v3, %v1237_v27 }
 0x5d3   : > { %v3856_v10 = vpop.f32.mrf.mxu0  ;;  %v3863_v11 = vpop.f32.mrf.mxu1 }
 0x5d4   : > { %v1390_v32 = vadd.f32 %v3856_v10, %v1313_v26  ;;  %v1312_v41 = vadd.f32 %v1299_v5, %v1235_v31  ;;  %v2274_v10 = vmul.u32 6, %v2273_v62 }
 0x5d5   : > { %v1373_v12 = vpop.f32.mrf.mxu0  ;;  %v1453_v13 = vpop.f32.mrf.mxu1 }
 0x5d6   : > { %v1388_v36 = vadd.f32 %v1373_v12, %v1311_v30  ;;  %v1467_v42 = vadd.f32 %v3862_v7, %v1390_v32 }
 0x5d7   : > { %v3857_v15 = vpop.f32.mrf.mxu0  ;;  %v3874_v16 = vpop.f32.mrf.mxu1 }
 0x5d8   : > { %v1391_v43 = vadd.f32 %v3857_v15, %v1314_v35  ;;  %v1465_v46 = vadd.f32 %v1450_v9, %v1388_v36 }
 0x5d9   : > { %v1376_v19 = vpop.f32.mrf.mxu0  ;;  %v1604_v20 = vpop.f32.mrf.mxu1 }
 0x5da   : > { %v1389_v2 = vadd.f32 %v1376_v19, %v1312_v41  ;;  %v1468_v53 = vadd.f32 %v3863_v11, %v1391_v43 }
 0x5db   : > { %v3868_v23 = vpop.f32.mrf.mxu0  ;;  %v3875_v24 = vpop.f32.mrf.mxu1 }
 0x5dc   : > { %v1544_v49 = vadd.f32 %v3868_v23, %v1467_v42  ;;  %v1466_v57 = vadd.f32 %v1453_v13, %v1389_v2 }
 0x5dd   : > { %v1527_v28 = vpop.f32.mrf.mxu0  ;;  %v1607_v29 = vpop.f32.mrf.mxu1 }
 0x5de   : > { %v1542_v54 = vadd.f32 %v1527_v28, %v1465_v46  ;;  %v1621_v58 = vadd.f32 %v3874_v16, %v1544_v49 }
 0x5df   : > { %v3869_v33 = vpop.f32.mrf.mxu0  ;;  %v3886_v34 = vpop.f32.mrf.mxu1 }
 0x5e0   : > { %v1545_v59 = vadd.f32 %v3869_v33, %v1468_v53  ;;  %v1619_v63 = vadd.f32 %v1604_v20, %v1542_v54  ;;  %v2275_v20 = vsub.s32 %v4379_v47, %v2274_v10  ;;  %v2261_v53 = vpop.permute.xlu0 %2260 }
 0x5e1   : > { %v1530_v37 = vpop.f32.mrf.mxu0  ;;  %v1758_v38 = vpop.f32.mrf.mxu1 }
 0x5e2   : > { %v1543_v1 = vadd.f32 %v1530_v37, %v1466_v57  ;;  %v1622_v6 = vadd.f32 %v3875_v24, %v1545_v59  ;;  %vm2278_vm15 = vcmp.ne.s32.totalorder %v2275_v20, 0  ;;  %vm2279_vm1 = vcmp.lt.s32.totalorder %v2275_v20, 0 }
 0x5e3   : > { %v3880_v44 = vpop.f32.mrf.mxu0  ;;  %v3887_v45 = vpop.f32.mrf.mxu1  ;;  %vm4586_vm2 = vmand %vm2279_vm1, %vm2278_vm15  ;;  %vm2407_vm15 = vcmask 48152   ;;  %vm2441_vm1 = vcmask 72752  }
 0x5e4   : > { %v1698_v3 = vadd.f32 %v3880_v44, %v1621_v58  ;;  %v1620_v11 = vadd.f32 %v1607_v29, %v1543_v1 }
 0x5e5   : > { %v1681_v51 = vpop.f32.mrf.mxu0  ;;  %v1761_v52 = vpop.f32.mrf.mxu1 }
 0x5e6   : > { %v1696_v7 = vadd.f32 %v1681_v51, %v1619_v63  ;;  %v1775_v12 = vadd.f32 %v3886_v34, %v1698_v3  ;;  %v2256_v51 = vpop.permute.xlu1 %2255 }
 0x5e7   : > { %v3881_v55 = vpop.f32.mrf.mxu0  ;;  %v3898_v56 = vpop.f32.mrf.mxu1 }
 0x5e8   : > { %v1699_v14 = vadd.f32 %v3881_v55, %v1622_v6  ;;  %v1773_v16 = vadd.f32 %v1758_v38, %v1696_v7  ;;  %v2281_v38 = vadd.s32 6, %v2275_v20 }
 0x5e9   : > { %v1684_v60 = vpop.f32.mrf.mxu0  ;;  %v1912_v61 = vpop.f32.mrf.mxu1 }
 0x5ea   : > { %v1697_v17 = vadd.f32 %v1684_v60, %v1620_v11  ;;  %v1776_v22 = vadd.f32 %v3887_v45, %v1699_v14  ;;  %v2282_v49 = vsel %vm4586_vm2, %v2281_v38, %v2275_v20  ;;  %v2246_v6 = vpop.permute.xlu1 %2245  ;;  %vm3309_vm2 = vcmask 8192  }
 0x5eb   : > { %v3892_v4 = vpop.f32.mrf.mxu0  ;;  %v3899_v5 = vpop.f32.mrf.mxu1  ;;  %vm4592_vm3 = vcmp.lt.s32.totalorder %v2282_v49, 3 }
 0x5ec   : > { %v1852_v18 = vadd.f32 %v3892_v4, %v1775_v12  ;;  %v1774_v26 = vadd.f32 %v1761_v52, %v1697_v17  ;;  %v2251_v12 = vpop.permute.xlu0 %2250 }
 0x5ed   : > { %v1835_v8 = vpop.f32.mrf.mxu0  ;;  %v1915_v9 = vpop.f32.mrf.mxu1 }
 0x5ee   : > { %v1850_v23 = vadd.f32 %v1835_v8, %v1773_v16  ;;  %v1929_v27 = vadd.f32 %v3898_v56, %v1852_v18 }
 0x5ef   : > { %v3893_v13 = vpop.f32.mrf.mxu0  ;;  %v3910_v15 = vpop.f32.mrf.mxu1 }
 0x5f0   : > { %v1853_v28 = vadd.f32 %v3893_v13, %v1776_v22  ;;  %v1927_v31 = vadd.f32 %v1912_v61, %v1850_v23 }
 0x5f1   : > { %v1838_v19 = vpop.f32.mrf.mxu0  ;;  %v2066_v21 = vpop.f32.mrf.mxu1 }
 0x5f2   : > { %v1851_v32 = vadd.f32 %v1838_v19, %v1774_v26  ;;  %v1930_v36 = vadd.f32 %v3899_v5, %v1853_v28 }
 0x5f3   : > { %v3904_v25 = vpop.f32.mrf.mxu0  ;;  %v3911_v24 = vpop.f32.mrf.mxu1 }
 0x5f4   : > { %v2006_v33 = vadd.f32 %v3904_v25, %v1929_v27  ;;  %v1928_v40 = vadd.f32 %v1915_v9, %v1851_v32 }
 0x5f5   : > { %v1989_v30 = vpop.f32.mrf.mxu0  ;;  %v2069_v29 = vpop.f32.mrf.mxu1 }
 0x5f6   : > { %v2004_v37 = vadd.f32 %v1989_v30, %v1927_v31  ;;  %v2083_v41 = vadd.f32 %v3910_v15, %v2006_v33 }
 0x5f7   : > { %v3905_v34 = vpop.f32.mrf.mxu0  ;;  %v3922_v35 = vpop.f32.mrf.mxu1 }
 0x5f8   : > { %v2007_v42 = vadd.f32 %v3905_v34, %v1930_v36  ;;  %v2081_v45 = vadd.f32 %v2066_v21, %v2004_v37 }
 0x5f9   : > { %v1992_v47 = vpop.f32.mrf.mxu0  ;;  %v2220_v44 = vpop.f32.mrf.mxu1 }
 0x5fa   : > { %v2005_v46 = vadd.f32 %v1992_v47, %v1928_v40  ;;  %v2084_v54 = vadd.f32 %v3911_v24, %v2007_v42 }
 0x5fb   : > { %v3916_v43 = vpop.f32.mrf.mxu0  ;;  %v3923_v58 = vpop.f32.mrf.mxu1 }
 0x5fc   : > { %v2160_v2 = vadd.f32 %v3916_v43, %v2083_v41  ;;  %v2082_v60 = vadd.f32 %v2069_v29, %v2005_v46 }
 0x5fd   : > { %v2143_v52 = vpop.f32.mrf.mxu0  ;;  %v2223_v7 = vpop.f32.mrf.mxu1 }
 0x5fe   : > { %v2237_v55 = vadd.f32 %v3922_v35, %v2160_v2  ;;  %v2158_v56 = vadd.f32 %v2143_v52, %v2081_v45 }
 0x5ff   : > { %v3917_v57 = vpop.f32.mrf.mxu0 }
 0x600   : > { %v2265_v61 = vadd.f32 %v2256_v51, %v2237_v55  ;;  %v2235_v62 = vadd.f32 %v2220_v44, %v2158_v56  ;;  %v2161_v63 = vadd.f32 %v3917_v57, %v2084_v54 }
 0x601   : > { %v2146_v1 = vpop.f32.mrf.mxu0 }
 0x602   : > { %v2238_v3 = vadd.f32 %v3923_v58, %v2161_v63  ;;  %v2159_v4 = vadd.f32 %v2146_v1, %v2082_v60  ;;  %v2286_v5 = vsel %vm4592_vm3, %v2265_v61, 0.0  ;;  %v2263_v9 = vadd.f32 %v2246_v6, %v2235_v62 }
 0x603   : > { %v2295_v8 = vsel %vm2288_vm4, %v2286_v5, 0.0 }
 0x604   : > { %v2266_v10 = vadd.f32 %v2261_v53, %v2238_v3  ;;  %v2236_v11 = vadd.f32 %v2223_v7, %v2159_v4  ;;  %2296 = vadd.xlane.f32.xlu1 %v2295_v8  ;;  %v2284_v17 = vsel %vm4592_vm3, %v2263_v9, 0.0 }
 0x605   : > { %v2289_v19 = vsel %vm2288_vm4, %v2284_v17, 0.0 }
 0x606   : > { %v2264_v14 = vadd.f32 %v2251_v12, %v2236_v11  ;;  %v2287_v13 = vsel %vm4592_vm3, %v2266_v10, 0.0 }
 0x607   : > { %v2298_v15 = vsel %vm2288_vm4, %v2287_v13, 0.0 }
 0x608   : > { %2299 = vadd.xlane.f32.xlu0 %v2298_v15  ;;  %v2285_v16 = vsel %vm4592_vm3, %v2264_v14, 0.0 }
 0x609   : > { %v2292_v18 = vsel %vm2288_vm4, %v2285_v16, 0.0 }
 0x60a   : > { %2293 = vadd.xlane.f32.xlu1 %v2292_v18 }
 0x60c   : > { %2290 = vadd.xlane.f32.xlu0 %v2289_v19 }
 0x68d   : > { %v2297_v21 = vpop.xlane.xlu1 %2296 }
 0x68e   : > { %v2303_v20 = vmul.f32 0.11111111, %v2297_v21 }
 0x690   : > { %v2307_v22 = vsub.f32 %v2265_v61, %v2303_v20 }
 0x691   : > { %v2300_v23 = vpop.xlane.xlu0 %2299 }
 0x692   : > { %v2304_v25 = vmul.f32 0.11111111, %v2300_v23  ;;  %v2311_v24 = vsel %vm4592_vm3, %v2307_v22, 0.0 }
 0x693   : > { %v2294_v26 = vpop.xlane.xlu1 %2293  ;;  %v2315_v27 = vmul.f32 %v2311_v24, %v2311_v24 }
 0x694   : > { %v2308_v28 = vsub.f32 %v2266_v10, %v2304_v25  ;;  %v2302_v30 = vmul.f32 0.11111111, %v2294_v26 }
 0x695   : > { %v2291_v29 = vpop.xlane.xlu0 %2290  ;;  %v2323_v31 = vsel %vm2288_vm4, %v2315_v27, 0.0 }
 0x696   : > { %v2306_v32 = vsub.f32 %v2264_v14, %v2302_v30  ;;  %v2301_v33 = vmul.f32 0.11111111, %v2291_v29  ;;  %2324 = vadd.xlane.f32.xlu0 %v2323_v31  ;;  %v2312_v34 = vsel %vm4592_vm3, %v2308_v28, 0.0 }
 0x697   : > { %v2316_v35 = vmul.f32 %v2312_v34, %v2312_v34  ;;  %v3302_v34 = vld [vmem:[%s4883_s8] sm:$0xff] }
 0x698   : > { %v2305_v36 = vsub.f32 %v2263_v9, %v2301_v33  ;;  %v2310_v37 = vsel %vm4592_vm3, %v2306_v32, 0.0  ;;  %v2463_v33 = vld [vmem:[%s4882_s7] sm:$0xf] }
 0x699   : > { %v2326_v38 = vsel %vm2288_vm4, %v2316_v35, 0.0  ;;  %v2314_v47 = vmul.f32 %v2310_v37, %v2310_v37 }
 0x69a   : > { %2327 = vadd.xlane.f32.xlu1 %v2326_v38  ;;  %v2309_v39 = vsel %vm4592_vm3, %v2305_v36, 0.0  ;;  %vm3315_vm3 = vcmask 24592  }
 0x69b   : > { %v2313_v40 = vmul.f32 %v2309_v39, %v2309_v39  ;;  %v2320_v42 = vsel %vm2288_vm4, %v2314_v47, 0.0 }
 0x69d   : > { %v2317_v41 = vsel %vm2288_vm4, %v2313_v40, 0.0  ;;  %v3631_v40 = vld [vmem:[%s4882_s7 + $0x8] sm:$0xf] }
 0x69e   : > { %2318 = vadd.xlane.f32.xlu0 %v2317_v41  ;;  %2321 = vadd.xlane.f32.xlu1 %v2320_v42  ;;  %v3633_v41 = vld [vmem:[%s4882_s7 + $0xc] sm:$0xf] }
 0x71f   : > { %v2325_v43 = vpop.xlane.xlu0 %2324 }
 0x720   : > { %v2331_v44 = vmul.f32 0.11111111, %v2325_v43 }
 0x722   : > { %v2335_v45 = vadd.f32 1e-05, %v2331_v44 }
 0x723   : > { %v2328_v46 = vpop.xlane.xlu1 %2327 }
 0x724   : > { %4153 = vrsqrt.f32 %v2335_v45  ;;  %v2332_v2 = vmul.f32 0.11111111, %v2328_v46  ;;  %v3635_v46 = vld [vmem:[%s4882_s7 + $0x10] sm:$0xf] }
 0x726   : > { %v2336_v49 = vadd.f32 1e-05, %v2332_v2  ;;  %v3637_v2 = vld [vmem:[%s4882_s7 + $0x14] sm:$0xf] }
 0x727   : > { %v2319_v51 = vpop.xlane.xlu0 %2318  ;;  %v2322_v52 = vpop.xlane.xlu1 %2321 }
 0x728   : > { %4155 = vrsqrt.f32 %v2336_v49  ;;  %v2329_v53 = vmul.f32 0.11111111, %v2319_v51  ;;  %v2330_v54 = vmul.f32 0.11111111, %v2322_v52 }
 0x72a   : > { %v2333_v55 = vadd.f32 1e-05, %v2329_v53  ;;  %v2334_v56 = vadd.f32 1e-05, %v2330_v54  ;;  %v3639_v54 = vld [vmem:[%s4882_s7 + $0x18] sm:$0xf] }
 0x72c   : > { %4157 = vrsqrt.f32 %v2333_v55  ;;  %v3641_v55 = vld [vmem:[%s4882_s7 + $0x1c] sm:$0xf] }
 0x72d   : > { %4159 = vrsqrt.f32 %v2334_v56 }
 0x731   : > { %v4154_v57 = vpop.eup %4153 }
 0x732   : > { %v2343_v58 = vmul.f32 %v4154_v57, %v2307_v22 }
 0x734   : > { %vm2347_vm5 = vcmp.ge.f32.partialorder %v2343_v58, 0.0  ;;  %v2351_v59 = vmul.f32 0.2, %v2343_v58 }
 0x735   : > { %v4156_v60 = vpop.eup %4155 }
 0x736   : > { %v4627_v61 = vsel %vm2347_vm5, %v2343_v58, %v2351_v59  ;;  %v2344_v62 = vmul.f32 %v4156_v60, %v2308_v28  ;;  %v3643_v60 = vld [vmem:[%s4882_s7 + $0x20] sm:$0xf] }
 0x737   : > { %v3669_v63 = vpack.c.bf16 %v4627_v61, %v4627_v61  ;;  %2360 = vst.msk [vmem:[%s4625_s30 + $0x10] sm:$0xff] %vm2357_vm6, %v4627_v61 }
 0x738   : > { %vm2348_vm7 = vcmp.ge.f32.partialorder %v2344_v62, 0.0  ;;  %v2352_v1 = vmul.f32 0.2, %v2344_v62 }
 0x739   : > { %v4158_v3 = vpop.eup %4157  ;;  %2378 = vrot.lane.b32.xlu0 %v3669_v63, %s4203_s25  ;;  %2416 = vrot.lane.b32.xlu1 %v3669_v63, %s4204_s27 }
 0x73a   : > { %v4160_v4 = vpop.eup %4159  ;;  %v4634_v5 = vsel %vm2348_vm7, %v2344_v62, %v2352_v1  ;;  %v2341_v6 = vmul.f32 %v4158_v3, %v2305_v36 }
 0x73b   : > { %v3670_v7 = vpack.c.bf16 %v4634_v5, %v4634_v5  ;;  %v2342_v8 = vmul.f32 %v4160_v4, %v2306_v32  ;;  %2361 = vst.msk [vmem:[%s4625_s30 + $0x18] sm:$0xff] %vm2357_vm6, %v4634_v5  ;;  %v3647_v4 = vld [vmem:[%s4882_s7 + $0x28] sm:$0xf] }
 0x73c   : > { %vm2345_vm8 = vcmp.ge.f32.partialorder %v2341_v6, 0.0  ;;  %v2349_v9 = vmul.f32 0.2, %v2341_v6 }
 0x73d   : > { %2450 = vrot.lane.b32.xlu1 %v3669_v63, %s4205_s23  ;;  %2418 = vrot.lane.b32.xlu0 %v3670_v7, %s4204_s27  ;;  %vm2346_vm9 = vcmp.ge.f32.partialorder %v2342_v8, 0.0  ;;  %v2350_v10 = vmul.f32 0.2, %v2342_v8 }
 0x73e   : > { %v4641_v11 = vsel %vm2345_vm8, %v2341_v6, %v2349_v9  ;;  %v3651_v9 = vld [vmem:[%s4882_s7 + $0x30] sm:$0xf] }
 0x73f   : > { %v3667_v12 = vpack.c.bf16 %v4641_v11, %v4641_v11  ;;  %v4645_v14 = vsel %vm2346_vm9, %v2342_v8, %v2350_v10  ;;  %2358 = vst.msk [vmem:[%s4625_s30] sm:$0xff] %vm2357_vm6, %v4641_v11  ;;  %v3653_v10 = vld [vmem:[%s4882_s7 + $0x34] sm:$0xf] }
 0x740   : > { %2359 = vst.msk [vmem:[%s4625_s30 + $0x8] sm:$0xff] %vm2357_vm6, %v4645_v14  ;;  %v3668_v13 = vpack.c.bf16 %v4645_v14, %v4645_v14 }
 0x741   : > { %2374 = vrot.lane.b32.xlu1 %v3667_v12, %s4203_s25  ;;  %2452 = vrot.lane.b32.xlu0 %v3670_v7, %s4205_s23 }
 0x745   : > { %2380 = vrot.lane.b32.xlu1 %v3670_v7, %s4203_s25  ;;  %2376 = vrot.lane.b32.xlu0 %v3668_v13, %s4203_s25  ;;  %s4207_s25 = smov 117  }
 0x749   : > { %2412 = vrot.lane.b32.xlu1 %v3667_v12, %s4204_s27  ;;  %2414 = vrot.lane.b32.xlu0 %v3668_v13, %s4204_s27  ;;  %s4912_s27 = smov 116  }
 0x74d   : > { %2446 = vrot.lane.b32.xlu1 %v3667_v12, %s4205_s23  ;;  %2448 = vrot.lane.b32.xlu0 %v3668_v13, %s4205_s23  ;;  %s4913_s23 = smov 115  }
 0x7ab   : > { %v2379_v15 = vpop.permute.xlu0 %2378  ;;  %v2417_v16 = vpop.permute.xlu1 %2416 }
 0x7ac   : > { %2389 = vst.msk [vmem:[#allocation4 + $0x8] sm:$0xf] %vm2386_vm10, %v2379_v15  ;;  %v3655_v15 = vld [vmem:[%s4882_s7 + $0x38] sm:$0xf] }
 0x7ad   : > { %2427 = vst.msk [vmem:[#allocation4 + $0x8] sm:$0xf] %vm2424_vm11, %v2417_v16  ;;  %v3657_v16 = vld [vmem:[%s4882_s7 + $0x3c] sm:$0xf] }
 0x7af   : > { %v2419_v17 = vpop.permute.xlu0 %2418  ;;  %v2451_v18 = vpop.permute.xlu1 %2450 }
 0x7b0   : > { %2461 = vst.msk [vmem:[#allocation4 + $0x8] sm:$0xf] %vm2458_vm12, %v2451_v18 }
 0x7b3   : > { %v2453_v19 = vpop.permute.xlu0 %2452  ;;  %v2375_v21 = vpop.permute.xlu1 %2374 }
 0x7b4   : > { %2387 = vst.msk [vmem:[#allocation4] sm:$0xf] %vm2386_vm10, %v2375_v21 }
 0x7b7   : > { %v2377_v20 = vpop.permute.xlu0 %2376  ;;  %v2381_v22 = vpop.permute.xlu1 %2380  ;;  %v2466_v27 = vld [vmem:[#allocation4 + $0x8] sm:$0xf] }
 0x7b8   : > { %2388 = vst.msk [vmem:[#allocation4 + $0x4] sm:$0xf] %vm2386_vm10, %v2377_v20  ;;  %2390 = vst.msk [vmem:[#allocation4 + $0xc] sm:$0xf] %vm2386_vm10, %v2381_v22 }
 0x7b9   : > { %2428 = vst.msk [vmem:[#allocation4 + $0xc] sm:$0xf] %vm2424_vm11, %v2419_v17 }
 0x7ba   : > { %2462 = vst.msk [vmem:[#allocation4 + $0xc] sm:$0xf] %vm2458_vm12, %v2453_v19 }
 0x7bb   : > { %v2415_v23 = vpop.permute.xlu0 %2414  ;;  %v2413_v25 = vpop.permute.xlu1 %2412 }
 0x7bc   : > { %2426 = vst.msk [vmem:[#allocation4 + $0x4] sm:$0xf] %vm2424_vm11, %v2415_v23  ;;  %2425 = vst.msk [vmem:[#allocation4] sm:$0xf] %vm2424_vm11, %v2413_v25 }
 0x7bf   : > { %v2449_v24 = vpop.permute.xlu0 %2448  ;;  %v2447_v26 = vpop.permute.xlu1 %2446 }
 0x7c0   : > { %2460 = vst.msk [vmem:[#allocation4 + $0x4] sm:$0xf] %vm2458_vm12, %v2449_v24  ;;  %2459 = vst.msk [vmem:[#allocation4] sm:$0xf] %vm2458_vm12, %v2447_v26 }
 0x7c1   : > { %v2467_v28 = vld [vmem:[#allocation4 + $0xc] sm:$0xf] }
 0x7c2   : > { %v3628_v30 = vcombine.low %v2466_v27, %v2467_v28 }
 0x7c4   : > { %2482 = vrot.lane.b32.xlu1 %v3628_v30, %s4187_s17  ;;  %3933 = vmatpush3.bf16.msra.mxu1 %v3628_v30 }
 0x7c5   : > { %3934 = vmatprep.subr.bf16.mxu1 %v4169_v0 }
 0x7c7   : > { %v2465_v29 = vld [vmem:[#allocation4 + $0x4] sm:$0xf]  ;;  %v2464_v31 = vld [vmem:[#allocation4] sm:$0xf] }
 0x7c8   : > { %v3627_v32 = vcombine.low %v2464_v31, %v2465_v29  ;;  %2578 = vrot.lane.b32.xlu1 %v3628_v30, %s4194_s20 }
 0x7ca   : > { %2480 = vrot.lane.b32.xlu0 %v3627_v32, %s4187_s17  ;;  %3935 = vmatpush3.bf16.msra.mxu1 %v3627_v32 }
 0x7cb   : > { %3948 = vmatprep.subr.bf16.mxu1 %v4169_v0 }
 0x7cc   : > { %2576 = vrot.lane.b32.xlu1 %v3627_v32, %s4194_s20 }
 0x7cd   : > { %3937 = vmatmul.mubr.msk.bf16.vlgmr.msra.gmra.mxu1 %vm650_vm14, %v2463_v33 }
 0x7ce   : > { %2630 = vrot.lane.b32.xlu0 %v3628_v30, %s4195_s13  ;;  %3952 = vmatprep.mubr.msk.bf16.mxu1 %vm4170_vm0, %v4169_v0 }
 0x7d0   : > { %2682 = vrot.lane.b32.xlu1 %v3628_v30, %s4908_s29 }
 0x7d2   : > { %2628 = vrot.lane.b32.xlu0 %v3627_v32, %s4195_s13 }
 0x7d4   : > { %2680 = vrot.lane.b32.xlu1 %v3627_v32, %s4908_s29 }
 0x7d6   : > { %2734 = vrot.lane.b32.xlu0 %v3628_v30, %s4909_s14 }
 0x7d8   : > { %2786 = vrot.lane.b32.xlu1 %v3628_v30, %s4910_s18 }
 0x7da   : > { %2732 = vrot.lane.b32.xlu0 %v3627_v32, %s4909_s14 }
 0x7dc   : > { %2784 = vrot.lane.b32.xlu1 %v3627_v32, %s4910_s18 }
 0x7de   : > { %2838 = vrot.lane.b32.xlu0 %v3628_v30, %s4911_s26 }
 0x7e0   : > { %2890 = vrot.lane.b32.xlu1 %v3628_v30, %s4206_s24 }
 0x7e2   : > { %2836 = vrot.lane.b32.xlu0 %v3627_v32, %s4911_s26  ;;  %s4914_s26 = smov 110  }
 0x7e4   : > { %2888 = vrot.lane.b32.xlu1 %v3627_v32, %s4206_s24  ;;  %s444_s24 = scalar_lea.vmem %s4887_s12, %s4916_s22 }
 0x7e6   : > { %2942 = vrot.lane.b32.xlu0 %v3628_v30, %s4207_s25 }
 0x7e8   : > { %2994 = vrot.lane.b32.xlu1 %v3628_v30, %s4912_s27 }
 0x7ea   : > { %2940 = vrot.lane.b32.xlu0 %v3627_v32, %s4207_s25 }
 0x7ec   : > { %2992 = vrot.lane.b32.xlu1 %v3627_v32, %s4912_s27 }
 0x7ee   : > { %3046 = vrot.lane.b32.xlu0 %v3628_v30, %s4913_s23 }
 0x7f0   : > { %3098 = vrot.lane.b32.xlu1 %v3628_v30, %s4180_s28 }
 0x7f2   : > { %3044 = vrot.lane.b32.xlu0 %v3627_v32, %s4913_s23 }
 0x7f4   : > { %3096 = vrot.lane.b32.xlu1 %v3627_v32, %s4180_s28 }
 0x7f6   : > { %3150 = vrot.lane.b32.xlu0 %v3628_v30, %s4208_s16 }
 0x7f8   : > { %3202 = vrot.lane.b32.xlu1 %v3628_v30, %s4209_s19 }
 0x7fa   : > { %3148 = vrot.lane.b32.xlu0 %v3627_v32, %s4208_s16 }
 0x7fc   : > { %3200 = vrot.lane.b32.xlu1 %v3627_v32, %s4209_s19 }
 0x7fe   : > { %3254 = vrot.lane.b32.xlu0 %v3628_v30, %s4914_s26 }
 0x800   : > { %3305 = vperm.xlu1 %4106, %v3302_v34  }
 0x802   : > { %3252 = vrot.lane.b32.xlu0 %v3627_v32, %s4914_s26 }
 0x804   : > { %958 = vrot.lane.b32.xlu1 %v4417_v50, %s4187_s17 }
 0x806   : > { %956 = vrot.lane.b32.xlu0 %v4411_v48, %s4187_s17 }
 0x808   : > { %976 = vrot.lane.b32.xlu1 %v4417_v50, %s4194_s20 }
 0x80a   : > { %974 = vrot.lane.b32.xlu0 %v4411_v48, %s4194_s20 }
 0x80c   : > { %2397 = vrot.lane.b32.xlu1 %v4645_v14, %s4195_s13 }
 0x80e   : > { %2395 = vrot.lane.b32.xlu0 %v4641_v11, %s4195_s13 }
 0x810   : > { %2401 = vrot.lane.b32.xlu1 %v4634_v5, %s4195_s13 }
 0x812   : > { %2399 = vrot.lane.b32.xlu0 %v4627_v61, %s4195_s13 }
 0x814   : > { %994 = vrot.lane.b32.xlu1 %v4417_v50, %s4195_s13 }
 0x816   : > { %992 = vrot.lane.b32.xlu0 %v4411_v48, %s4195_s13  ;;  %v3626_v48 = vld [vmem:[%s4882_s7 + $0x4] sm:$0xf] }
 0x818   : > { %2431 = vrot.lane.b32.xlu1 %v4645_v14, %s4909_s14 }
 0x81a   : > { %2429 = vrot.lane.b32.xlu0 %v4641_v11, %s4909_s14 }
 0x81c   : > { %2435 = vrot.lane.b32.xlu1 %v4634_v5, %s4909_s14  ;;  %v3649_v5 = vld [vmem:[%s4882_s7 + $0x2c] sm:$0xf] }
 0x81e   : > { %2433 = vrot.lane.b32.xlu0 %v4627_v61, %s4909_s14  ;;  %v3645_v61 = vld [vmem:[%s4882_s7 + $0x24] sm:$0xf] }
 0x836   : > { %v2483_v35 = vpop.permute.xlu1 %2482 }
 0x837   : > { %3925 = vmatpush3.bf16.msra.mxu0 %v2483_v35 }
 0x838   : > { %3926 = vmatprep.subr.bf16.mxu0 %v4169_v0 }
 0x83a   : > { %v2579_v50 = vpop.permute.xlu1 %2578 }
 0x83c   : > { %v2481_v36 = vpop.permute.xlu0 %2480 }
 0x83d   : > { %3927 = vmatpush3.bf16.msra.mxu0 %v2481_v36 }
 0x83e   : > { %v2577_v37 = vpop.permute.xlu1 %2576  ;;  %3940 = vmatprep.subr.bf16.mxu0 %v4169_v0 }
 0x840   : > { %v2631_v38 = vpop.permute.xlu0 %2630  ;;  %3929 = vmatmul.mubr.msk.bf16.vlgmr.msra.gmra.mxu0 %vm650_vm14, %v3626_v48 }
 0x841   : > { %3941 = vmatpush3.bf16.msra.mxu0 %v2579_v50  ;;  %3949 = vmatpush3.bf16.msra.mxu1 %v2631_v38 }
 0x842   : > { %v2683_v47 = vpop.permute.xlu1 %2682  ;;  %3942 = vmatprep.subr.bf16.mxu0 %v4169_v0  ;;  %3950 = vmatprep.subr.bf16.mxu1 %v4169_v0 }
 0x843   : > { %3944 = vmatprep.mubr.msk.bf16.mxu0 %vm4170_vm0, %v4169_v0 }
 0x844   : > { %v2629_v39 = vpop.permute.xlu0 %2628 }
 0x845   : > { %3943 = vmatpush3.bf16.msra.mxu0 %v2577_v37  ;;  %3951 = vmatpush3.bf16.msra.mxu1 %v2629_v39 }
 0x846   : > { %v2681_v42 = vpop.permute.xlu1 %2680  ;;  %3956 = vmatprep.subr.bf16.mxu0 %v4169_v0  ;;  %3964 = vmatprep.subr.bf16.mxu1 %v4169_v0 }
 0x848   : > { %v2735_v43 = vpop.permute.xlu0 %2734  ;;  %3945 = vmatmul.mubr.msk.bf16.vlgmr.msra.gmra.mxu0 %vm650_vm14, %v3631_v40  ;;  %3953 = vmatmul.mubr.msk.bf16.vlgmr.msra.gmra.mxu1 %vm650_vm14, %v3633_v41 }
 0x849   : > { %3957 = vmatpush3.bf16.msra.mxu0 %v2683_v47  ;;  %3965 = vmatpush3.bf16.msra.mxu1 %v2735_v43 }
 0x84a   : > { %v2787_v44 = vpop.permute.xlu1 %2786  ;;  %3958 = vmatprep.subr.bf16.mxu0 %v4169_v0  ;;  %3966 = vmatprep.subr.bf16.mxu1 %v4169_v0 }
 0x84b   : > { %3960 = vmatprep.mubr.msk.bf16.mxu0 %vm4170_vm0, %v4169_v0  ;;  %3968 = vmatprep.mubr.msk.bf16.mxu1 %vm4170_vm0, %v4169_v0 }
 0x84c   : > { %v2733_v45 = vpop.permute.xlu0 %2732 }
 0x84d   : > { %3959 = vmatpush3.bf16.msra.mxu0 %v2681_v42  ;;  %3967 = vmatpush3.bf16.msra.mxu1 %v2733_v45 }
 0x84e   : > { %v2785_v49 = vpop.permute.xlu1 %2784  ;;  %3972 = vmatprep.subr.bf16.mxu0 %v4169_v0  ;;  %3980 = vmatprep.subr.bf16.mxu1 %v4169_v0 }
 0x850   : > { %v2839_v51 = vpop.permute.xlu0 %2838  ;;  %3961 = vmatmul.mubr.msk.bf16.vlgmr.msra.gmra.mxu0 %vm650_vm14, %v3635_v46  ;;  %3969 = vmatmul.mubr.msk.bf16.vlgmr.msra.gmra.mxu1 %vm650_vm14, %v3637_v2 }
 0x851   : > { %3973 = vmatpush3.bf16.msra.mxu0 %v2787_v44  ;;  %3981 = vmatpush3.bf16.msra.mxu1 %v2839_v51 }
 0x852   : > { %v2891_v52 = vpop.permute.xlu1 %2890  ;;  %3974 = vmatprep.subr.bf16.mxu0 %v4169_v0  ;;  %3982 = vmatprep.subr.bf16.mxu1 %v4169_v0 }
 0x853   : > { %3976 = vmatprep.mubr.msk.bf16.mxu0 %vm4170_vm0, %v4169_v0  ;;  %3984 = vmatprep.mubr.msk.bf16.mxu1 %vm4170_vm0, %v4169_v0 }
 0x854   : > { %v2837_v53 = vpop.permute.xlu0 %2836 }
 0x855   : > { %3975 = vmatpush3.bf16.msra.mxu0 %v2785_v49  ;;  %3983 = vmatpush3.bf16.msra.mxu1 %v2837_v53 }
 0x856   : > { %v2889_v56 = vpop.permute.xlu1 %2888  ;;  %3988 = vmatprep.subr.bf16.mxu0 %v4169_v0  ;;  %3996 = vmatprep.subr.bf16.mxu1 %v4169_v0 }
 0x858   : > { %v2943_v57 = vpop.permute.xlu0 %2942  ;;  %3977 = vmatmul.mubr.msk.bf16.vlgmr.msra.gmra.mxu0 %vm650_vm14, %v3639_v54  ;;  %3985 = vmatmul.mubr.msk.bf16.vlgmr.msra.gmra.mxu1 %vm650_vm14, %v3641_v55 }
 0x859   : > { %3989 = vmatpush3.bf16.msra.mxu0 %v2891_v52  ;;  %3997 = vmatpush3.bf16.msra.mxu1 %v2943_v57 }
 0x85a   : > { %v2995_v58 = vpop.permute.xlu1 %2994  ;;  %3990 = vmatprep.subr.bf16.mxu0 %v4169_v0  ;;  %3998 = vmatprep.subr.bf16.mxu1 %v4169_v0 }
 0x85b   : > { %3992 = vmatprep.mubr.msk.bf16.mxu0 %vm4170_vm0, %v4169_v0  ;;  %4000 = vmatprep.mubr.msk.bf16.mxu1 %vm4170_vm0, %v4169_v0 }
 0x85c   : > { %v2941_v59 = vpop.permute.xlu0 %2940 }
 0x85d   : > { %3991 = vmatpush3.bf16.msra.mxu0 %v2889_v56  ;;  %3999 = vmatpush3.bf16.msra.mxu1 %v2941_v59 }
 0x85e   : > { %v2993_v62 = vpop.permute.xlu1 %2992  ;;  %4004 = vmatprep.subr.bf16.mxu0 %v4169_v0  ;;  %4012 = vmatprep.subr.bf16.mxu1 %v4169_v0 }
 0x860   : > { %v3047_v63 = vpop.permute.xlu0 %3046  ;;  %3993 = vmatmul.mubr.msk.bf16.vlgmr.msra.gmra.mxu0 %vm650_vm14, %v3643_v60  ;;  %4001 = vmatmul.mubr.msk.bf16.vlgmr.msra.gmra.mxu1 %vm650_vm14, %v3645_v61 }
 0x861   : > { %4005 = vmatpush3.bf16.msra.mxu0 %v2995_v58  ;;  %4013 = vmatpush3.bf16.msra.mxu1 %v3047_v63 }
 0x862   : > { %v3099_v1 = vpop.permute.xlu1 %3098  ;;  %4006 = vmatprep.subr.bf16.mxu0 %v4169_v0  ;;  %4014 = vmatprep.subr.bf16.mxu1 %v4169_v0 }
 0x863   : > { %4008 = vmatprep.mubr.msk.bf16.mxu0 %vm4170_vm0, %v4169_v0  ;;  %4016 = vmatprep.mubr.msk.bf16.mxu1 %vm4170_vm0, %v4169_v0 }
 0x864   : > { %v3045_v3 = vpop.permute.xlu0 %3044 }
 0x865   : > { %4007 = vmatpush3.bf16.msra.mxu0 %v2993_v62  ;;  %4015 = vmatpush3.bf16.msra.mxu1 %v3045_v3 }
 0x866   : > { %4020 = vmatprep.subr.bf16.mxu0 %v4169_v0  ;;  %4028 = vmatprep.subr.bf16.mxu1 %v4169_v0  ;;  %v3097_v6 = vpop.permute.xlu1 %3096 }
 0x868   : > { %v3151_v7 = vpop.permute.xlu0 %3150  ;;  %4009 = vmatmul.mubr.msk.bf16.vlgmr.msra.gmra.mxu0 %vm650_vm14, %v3647_v4  ;;  %4017 = vmatmul.mubr.msk.bf16.vlgmr.msra.gmra.mxu1 %vm650_vm14, %v3649_v5 }
 0x869   : > { %4021 = vmatpush3.bf16.msra.mxu0 %v3099_v1  ;;  %4029 = vmatpush3.bf16.msra.mxu1 %v3151_v7 }
 0x86a   : > { %4022 = vmatprep.subr.bf16.mxu0 %v4169_v0  ;;  %4030 = vmatprep.subr.bf16.mxu1 %v4169_v0  ;;  %v3203_v11 = vpop.permute.xlu1 %3202 }
 0x86b   : > { %4024 = vmatprep.mubr.msk.bf16.mxu0 %vm4170_vm0, %v4169_v0  ;;  %4032 = vmatprep.mubr.msk.bf16.mxu1 %vm4170_vm0, %v4169_v0 }
 0x86c   : > { %v3149_v8 = vpop.permute.xlu0 %3148 }
 0x86d   : > { %4023 = vmatpush3.bf16.msra.mxu0 %v3097_v6  ;;  %4031 = vmatpush3.bf16.msra.mxu1 %v3149_v8 }
 0x86e   : > { %4036 = vmatprep.subr.bf16.mxu0 %v4169_v0  ;;  %4044 = vmatprep.subr.bf16.mxu1 %v4169_v0  ;;  %v3201_v14 = vpop.permute.xlu1 %3200 }
 0x870   : > { %v3255_v12 = vpop.permute.xlu0 %3254  ;;  %4025 = vmatmul.mubr.msk.bf16.vlgmr.msra.gmra.mxu0 %vm650_vm14, %v3651_v9  ;;  %4033 = vmatmul.mubr.msk.bf16.vlgmr.msra.gmra.mxu1 %vm650_vm14, %v3653_v10 }
 0x871   : > { %4037 = vmatpush3.bf16.msra.mxu0 %v3203_v11  ;;  %4045 = vmatpush3.bf16.msra.mxu1 %v3255_v12 }
 0x872   : > { %4038 = vmatprep.subr.bf16.mxu0 %v4169_v0  ;;  %4046 = vmatprep.subr.bf16.mxu1 %v4169_v0 }
 0x873   : > { %4040 = vmatprep.mubr.msk.bf16.mxu0 %vm4170_vm0, %v4169_v0  ;;  %4048 = vmatprep.mubr.msk.bf16.mxu1 %vm4170_vm0, %v4169_v0  ;;  %vm980_vm0 = vcmask 97344  }
 0x874   : > { %v3253_v13 = vpop.permute.xlu0 %3252 }
 0x875   : > { %4039 = vmatpush3.bf16.msra.mxu0 %v3201_v14  ;;  %4047 = vmatpush3.bf16.msra.mxu1 %v3253_v13 }
 0x878   : > { %v957_v17 = vpop.permute.xlu0 %956  ;;  %4041 = vmatmul.mubr.msk.bf16.vlgmr.msra.gmra.mxu0 %vm650_vm14, %v3655_v15  ;;  %4049 = vmatmul.mubr.msk.bf16.vlgmr.msra.gmra.mxu1 %vm650_vm14, %v3657_v16  ;;  %vm998_vm14 = vcmask 130144  }
 0x879   : > { %963 = vst.msk [vmem:[%s4409_s15] sm:$0xff] %vm962_vm13, %v957_v17 }
 0x87b   : > { %v4843_v0 = vpop.permute.xlu1 %3305 }
 0x87c   : > { %v975_v18 = vpop.permute.xlu0 %974 }
 0x87d   : > { %981 = vst.msk [vmem:[%s4409_s15] sm:$0xff] %vm980_vm0, %v975_v18 }
 0x87f   : > { %v959_v19 = vpop.permute.xlu1 %958 }
 0x880   : > { %964 = vst.msk [vmem:[%s4409_s15 + $0x8] sm:$0xff] %vm962_vm13, %v959_v19  ;;  %v2396_v21 = vpop.permute.xlu0 %2395 }
 0x881   : > { %2408 = vst.msk [vmem:[%s4625_s30] sm:$0xff] %vm2407_vm15, %v2396_v21 }
 0x883   : > { %v977_v20 = vpop.permute.xlu1 %976 }
 0x884   : > { %982 = vst.msk [vmem:[%s4409_s15 + $0x8] sm:$0xff] %vm980_vm0, %v977_v20  ;;  %v2400_v22 = vpop.permute.xlu0 %2399 }
 0x885   : > { %2410 = vst.msk [vmem:[%s4625_s30 + $0x10] sm:$0xff] %vm2407_vm15, %v2400_v22 }
 0x887   : > { %v2398_v23 = vpop.permute.xlu1 %2397 }
 0x888   : > { %2409 = vst.msk [vmem:[%s4625_s30 + $0x8] sm:$0xff] %vm2407_vm15, %v2398_v23  ;;  %v993_v25 = vpop.permute.xlu0 %992 }
 0x889   : > { %999 = vst.msk [vmem:[%s4409_s15] sm:$0xff] %vm998_vm14, %v993_v25 }
 0x88b   : > { %v2402_v24 = vpop.permute.xlu1 %2401 }
 0x88c   : > { %2411 = vst.msk [vmem:[%s4625_s30 + $0x18] sm:$0xff] %vm2407_vm15, %v2402_v24  ;;  %v2430_v26 = vpop.permute.xlu0 %2429 }
 0x88d   : > { %2442 = vst.msk [vmem:[%s4625_s30] sm:$0xff] %vm2441_vm1, %v2430_v26  ;;  %v2568_v27 = vpop.f32.mrf.mxu1 }
 0x88f   : > { %v995_v28 = vpop.permute.xlu1 %994  ;;  %v3938_v30 = vpop.f32.mrf.mxu1 }
 0x890   : > { %1000 = vst.msk [vmem:[%s4409_s15 + $0x8] sm:$0xff] %vm998_vm14, %v995_v28  ;;  %v2434_v29 = vpop.permute.xlu0 %2433 }
 0x891   : > { %2444 = vst.msk [vmem:[%s4625_s30 + $0x10] sm:$0xff] %vm2441_vm1, %v2434_v29  ;;  %v2571_v31 = vpop.f32.mrf.mxu1 }
 0x893   : > { %v2432_v32 = vpop.permute.xlu1 %2431  ;;  %v3939_v33 = vpop.f32.mrf.mxu1 }
 0x894   : > { %2443 = vst.msk [vmem:[%s4625_s30 + $0x8] sm:$0xff] %vm2441_vm1, %v2432_v32 }
 0x897   : > { %v2436_v34 = vpop.permute.xlu1 %2435 }
 0x898   : > { %2445 = vst.msk [vmem:[%s4625_s30 + $0x18] sm:$0xff] %vm2441_vm1, %v2436_v34 }
 0x900   : > { %v2523_v35 = vpop.f32.mrf.mxu0 }
 0x901   : > { %v2569_v49 = vadd.f32 %v2568_v27, %v2523_v35 }
 0x902   : > { %v3930_v50 = vpop.f32.mrf.mxu0 }
 0x904   : > { %v2526_v36 = vpop.f32.mrf.mxu0 }
 0x906   : > { %v3931_v48 = vpop.f32.mrf.mxu0 }
 0x908   : > { %v2619_v37 = vpop.f32.mrf.mxu0  ;;  %v2671_v38 = vpop.f32.mrf.mxu1 }
 0x909   : > { %v2625_v53 = vadd.f32 %v2619_v37, %v2569_v49 }
 0x90a   : > { %v3946_v47 = vpop.f32.mrf.mxu0  ;;  %v3954_v39 = vpop.f32.mrf.mxu1 }
 0x90b   : > { %v2677_v58 = vadd.f32 %v2671_v38, %v2625_v53 }
 0x90c   : > { %v2622_v40 = vpop.f32.mrf.mxu0  ;;  %v2674_v41 = vpop.f32.mrf.mxu1 }
 0x90e   : > { %v3947_v42 = vpop.f32.mrf.mxu0  ;;  %v3955_v43 = vpop.f32.mrf.mxu1 }
 0x910   : > { %v2723_v44 = vpop.f32.mrf.mxu0  ;;  %v2775_v45 = vpop.f32.mrf.mxu1 }
 0x911   : > { %v2729_v61 = vadd.f32 %v2723_v44, %v2677_v58 }
 0x912   : > { %v3962_v46 = vpop.f32.mrf.mxu0  ;;  %v3970_v2 = vpop.f32.mrf.mxu1 }
 0x913   : > { %v2781_v4 = vadd.f32 %v2775_v45, %v2729_v61 }
 0x914   : > { %v2726_v51 = vpop.f32.mrf.mxu0  ;;  %v2778_v52 = vpop.f32.mrf.mxu1 }
 0x916   : > { %v3963_v54 = vpop.f32.mrf.mxu0  ;;  %v3971_v55 = vpop.f32.mrf.mxu1 }
 0x918   : > { %v2827_v56 = vpop.f32.mrf.mxu0  ;;  %v2879_v57 = vpop.f32.mrf.mxu1 }
 0x919   : > { %v2833_v7 = vadd.f32 %v2827_v56, %v2781_v4 }
 0x91a   : > { %v3978_v59 = vpop.f32.mrf.mxu0  ;;  %v3986_v60 = vpop.f32.mrf.mxu1 }
 0x91b   : > { %v2885_v12 = vadd.f32 %v2879_v57, %v2833_v7 }
 0x91c   : > { %v2830_v62 = vpop.f32.mrf.mxu0  ;;  %v2882_v63 = vpop.f32.mrf.mxu1 }
 0x91e   : > { %v3979_v1 = vpop.f32.mrf.mxu0  ;;  %v3987_v3 = vpop.f32.mrf.mxu1 }
 0x920   : > { %v2931_v5 = vpop.f32.mrf.mxu0  ;;  %v2983_v6 = vpop.f32.mrf.mxu1 }
 0x921   : > { %v2937_v15 = vadd.f32 %v2931_v5, %v2885_v12 }
 0x922   : > { %v3994_v8 = vpop.f32.mrf.mxu0  ;;  %v4002_v9 = vpop.f32.mrf.mxu1 }
 0x923   : > { %v2989_v21 = vadd.f32 %v2983_v6, %v2937_v15 }
 0x924   : > { %v2934_v10 = vpop.f32.mrf.mxu0  ;;  %v2986_v11 = vpop.f32.mrf.mxu1 }
 0x926   : > { %v3995_v14 = vpop.f32.mrf.mxu0  ;;  %v4003_v13 = vpop.f32.mrf.mxu1 }
 0x928   : > { %v3035_v16 = vpop.f32.mrf.mxu0  ;;  %v3087_v17 = vpop.f32.mrf.mxu1 }
 0x929   : > { %v3041_v23 = vadd.f32 %v3035_v16, %v2989_v21 }
 0x92a   : > { %v4010_v18 = vpop.f32.mrf.mxu0  ;;  %v4018_v19 = vpop.f32.mrf.mxu1 }
 0x92b   : > { %v3093_v28 = vadd.f32 %v3087_v17, %v3041_v23 }
 0x92c   : > { %v3038_v20 = vpop.f32.mrf.mxu0  ;;  %v3090_v22 = vpop.f32.mrf.mxu1 }
 0x92e   : > { %v4011_v25 = vpop.f32.mrf.mxu0  ;;  %v4019_v24 = vpop.f32.mrf.mxu1 }
 0x930   : > { %v3139_v26 = vpop.f32.mrf.mxu0  ;;  %v3191_v27 = vpop.f32.mrf.mxu1 }
 0x931   : > { %v3145_v31 = vadd.f32 %v3139_v26, %v3093_v28 }
 0x932   : > { %v4026_v30 = vpop.f32.mrf.mxu0  ;;  %v4034_v29 = vpop.f32.mrf.mxu1 }
 0x933   : > { %v3197_v50 = vadd.f32 %v3191_v27, %v3145_v31 }
 0x934   : > { %v3142_v32 = vpop.f32.mrf.mxu0  ;;  %v3194_v33 = vpop.f32.mrf.mxu1 }
 0x936   : > { %v4027_v34 = vpop.f32.mrf.mxu0  ;;  %v4035_v35 = vpop.f32.mrf.mxu1 }
 0x938   : > { %v3243_v36 = vpop.f32.mrf.mxu0  ;;  %v3295_v48 = vpop.f32.mrf.mxu1 }
 0x939   : > { %v3249_v37 = vadd.f32 %v3243_v36, %v3197_v50 }
 0x93a   : > { %v4042_v38 = vpop.f32.mrf.mxu0  ;;  %v4050_v47 = vpop.f32.mrf.mxu1 }
 0x93b   : > { %v3301_v39 = vadd.f32 %v3295_v48, %v3249_v37 }
 0x93c   : > { %v3246_v40 = vpop.f32.mrf.mxu0  ;;  %v3298_v41 = vpop.f32.mrf.mxu1 }
 0x93d   : > { %v3308_v42 = vadd.f32 %v4843_v0, %v3301_v39 }
 0x93e   : > { %v4043_v43 = vpop.f32.mrf.mxu0  ;;  %v4051_v44 = vpop.f32.mrf.mxu1 }
 0x93f   : > { %3310 = vst.msk [vmem:[%s444_s24] sm:$0x1] %vm3309_vm2, %v3308_v42  ;;  %3312 = vrot.lane.b32.xlu0 %v3308_v42, %s4195_s13 }
 0x9b1   : > { %v3313_v45 = vpop.permute.xlu0 %3312 }
 0x9b2   : > { %3316 = vst.msk [vmem:[%s444_s24] sm:$0x1] %vm3315_vm3, %v3313_v45 }
 0x9b3 PF: > { %s23_s21 = sadd.s32 1, %s4167_s21  }
 0x9b4   : > { %p20_p4 = scmp.ge.s32.totalorder %s23_s21, 4  }
 0x9b6   :  { %22 = sbr.rel (!%p20_p4) target bundleno = 1 (0x1), region = 155 }

</bundles_post_ra>
